<compile_context>
chip_gen: v7x
topology: tpu7x:2x2x1
jax: 0.10.0
libtpu: 0.0.40
codegen_flags: <defaults>
</compile_context>

<pallas_src>
import jax
import jax.numpy as jnp
from jax import lax
from jax.experimental import pallas as pl
from jax.experimental.pallas import tpu as pltpu


# ---------------- model dims (small, consistent with the module) ----------------
B = 2              # batch
BP = 8             # batch padded to one sublane tile
T = 8              # max sequence length
E = 32             # embedding_dim
H = 32             # hidden_dim
K = 8              # tagset_size
KPAD = 128         # lane-dense padded tag width for the output store
VOCAB = 50         # vocab_size
VOCAB_PAD = 128    # padded vocab for the one-hot gather matmul
NUM_DIRS = 2       # bidirectional
D2 = 2 * H         # 64  : combined fwd|bwd hidden width
G8 = 8 * H         # 256 : combined gate width (4 gates x 2 directions)


def lstm_tagger_kernel(
    ids_ref,      # (T*BP, 1)        i32  token ids, time-major padded rows (row = t*8 + b)
    len_ref,      # (BP, 1)          i32  sequence lengths (0 for padded batch rows)
    emb_ref,      # (VOCAB_PAD, E)   f32  embedding table (zero-padded rows)
    wih_ref,      # (E, G8)          f32  fused input-proj weights, gate-major interleaved
    bih_ref,      # (1, G8)          f32  fused bias (b_ih + b_hh), same column order
    whh_ref,      # (D2, G8)         f32  fused recurrent weights (block structured)
    wtag_ref,     # (D2, KPAD)       f32  hidden2tag W^T, zero-padded columns
    btag_ref,     # (1, KPAD)        f32  hidden2tag bias, -1e9 on padded columns
    out_ref,      # (T*BP, KPAD)     f32  log_softmax(tag_space), flat time-major
):
    f32 = jnp.float32

    # ---- in-kernel embedding gather as a one-hot MXU matmul ----
    ids = ids_ref[...]                                                     # (64, 1) i32
    vocab_iota = lax.broadcasted_iota(jnp.int32, (T * BP, VOCAB_PAD), 1)
    onehot = (vocab_iota == ids).astype(f32)                               # (64, 128)
    emb = jnp.dot(onehot, emb_ref[...], preferred_element_type=f32)        # (64, 32)

    # ---- fused input projection (both directions, bias folded), one matmul ----
    xproj = jnp.dot(emb, wih_ref[...], preferred_element_type=f32) + bih_ref[...]   # (64, 256)

    # ---- hoisted lane masks / constants ----
    lane_g = lax.broadcasted_iota(jnp.int32, (BP, G8), 1)
    g_cols = (lane_g >= 2 * D2) & (lane_g < 3 * D2)          # "g" gate block -> tanh
    fwd_cols = (lane_g % D2) < H                             # forward-direction lanes
    halfscale = jnp.where(g_cols, jnp.float32(1.0), jnp.float32(0.5))

    lens = len_ref[...]                                      # (8, 1) i32
    lane_h = lax.broadcasted_iota(jnp.int32, (BP, D2), 1)
    m_comb = []
    for t in range(T):
        rt = T - 1 - t
        thr = jnp.where(lane_h < H, t, rt)                   # fwd lanes test t, bwd lanes test rt
        m_comb.append(lens > thr)                            # (8, 64) bool, precomputed once

    whh = whh_ref[...]                                       # (64, 256)

    h2 = jnp.zeros((BP, D2), f32)                            # [h_f | h_b]
    c2 = jnp.zeros((BP, D2), f32)                            # [c_f | c_b]
    fwd_outs = [None] * T
    bwd_outs = [None] * T

    # ---- fused fwd+bwd recurrence, fully unrolled (T = 8) ----
    for t in range(T):
        rt = T - 1 - t
        # forward lanes read the projection at time t, backward lanes at time rt
        xp = jnp.where(fwd_cols,
                       xproj[t * BP:(t + 1) * BP, :],
                       xproj[rt * BP:(rt + 1) * BP, :])
        gates = xp + jnp.dot(h2, whh, preferred_element_type=f32)          # (8, 256)

        # single tanh pass: sigmoid(x) = 0.5 * (1 + tanh(x/2)) for i/f/o lanes
        y = jnp.tanh(gates * halfscale)
        act = jnp.where(g_cols, y, jnp.float32(0.5) * (y + jnp.float32(1.0)))

        i_g = act[:, 0 * D2:1 * D2]
        f_g = act[:, 1 * D2:2 * D2]
        g_g = act[:, 2 * D2:3 * D2]
        o_g = act[:, 3 * D2:4 * D2]
        c_new = f_g * c2 + i_g * g_g
        h_new = o_g * jnp.tanh(c_new)

        m = m_comb[t]
        out_t = jnp.where(m, h_new, 0.0)                     # padded positions emit zeros
        fwd_outs[t] = out_t[:, :H]                           # forward output for time t
        bwd_outs[rt] = out_t[:, H:]                          # backward output for time rt

        # freeze state past sequence end (backward dir stays zero until rt < len)
        h2 = jnp.where(m, h_new, h2)
        c2 = jnp.where(m, c_new, c2)

    # ---- hidden2tag as ONE matmul from register-resident outputs + log_softmax ----
    rows = [jnp.concatenate([fwd_outs[t], bwd_outs[t]], axis=1) for t in range(T)]
    hall = jnp.concatenate(rows, axis=0)                     # (64, 64)
    logits = (jnp.dot(hall, wtag_ref[...], preferred_element_type=f32)
              + btag_ref[...])                               # (64, 128), pad cols ~ -1e9

    m_max = jnp.max(logits, axis=-1, keepdims=True)
    shifted = logits - m_max
    lse = jnp.log(jnp.sum(jnp.exp(shifted), axis=-1, keepdims=True))
    out_ref[...] = shifted - lse


def _interleave_gate_cols(wf, wb):
    """(rows, 4H) x 2 in PyTorch gate order i,f,g,o -> (rows, 8H) [i_f i_b f_f f_b g_f g_b o_f o_b]."""
    parts = []
    for g in range(4):
        parts.append(wf[:, g * H:(g + 1) * H])
        parts.append(wb[:, g * H:(g + 1) * H])
    return jnp.concatenate(parts, axis=1)


def lstm_tagger_forward(sentences, lengths, params):
    """sentences: (B, T) int32 token ids; lengths: (B,) int32 (sorted desc)."""
    # tiny int layout prep: time-major padded token ids + padded lengths
    ids_tm = jnp.zeros((T, BP), jnp.int32).at[:, :B].set(sentences.T.astype(jnp.int32))
    ids_tm = ids_tm.reshape(T * BP, 1)
    lens_pad = jnp.zeros((BP, 1), jnp.int32).at[:B, 0].set(lengths.astype(jnp.int32))

    # parameter prep (would be done once / constant-folded for fixed weights)
    emb_pad = jnp.zeros((VOCAB_PAD, E), jnp.float32).at[:VOCAB, :].set(params["embedding"])
    wih_cat = _interleave_gate_cols(params["wih_f"], params["wih_b"])          # (E, 256)
    b_cat = _interleave_gate_cols(params["b_f"], params["b_b"])                # (1, 256)
    whh_top = _interleave_gate_cols(params["whh_f"], jnp.zeros_like(params["whh_b"]))
    whh_bot = _interleave_gate_cols(jnp.zeros_like(params["whh_f"]), params["whh_b"])
    whh_bd = jnp.concatenate([whh_top, whh_bot], axis=0)                       # (64, 256)
    wtag_pad = jnp.zeros((D2, KPAD), jnp.float32).at[:, :K].set(params["wtag"])
    btag_pad = jnp.full((1, KPAD), -1e9, jnp.float32).at[:, :K].set(params["btag"])

    vmem = pl.BlockSpec(memory_space=pltpu.MemorySpace.VMEM)

    out_flat = pl.pallas_call(
        lstm_tagger_kernel,
        out_shape=jax.ShapeDtypeStruct((T * BP, KPAD), jnp.float32),
        in_specs=[vmem] * 8,
        out_specs=vmem,
    )(ids_tm, lens_pad, emb_pad, wih_cat, b_cat, whh_bd, wtag_pad, btag_pad)

    # (T*BP, KPAD) -> (B, T, K): slice padded batch rows / tag lanes, batch-first
    return out_flat.reshape(T, BP, KPAD)[:, :B, :K].transpose(1, 0, 2)


def reference_forward(sentences, lengths, params):
    """Pure-JAX reference with identical packed bi-LSTM semantics (original layout)."""
    embeds = params["embedding"][sentences]                  # (B, T, E)
    x = jnp.transpose(embeds, (1, 0, 2))                     # (T, B, E)
    lens = lengths.reshape(B, 1)

    def run_dir(wih, whh, b, reverse):
        h = jnp.zeros((B, H), jnp.float32)
        c = jnp.zeros((B, H), jnp.float32)
        outs = [None] * T
        order = range(T - 1, -1, -1) if reverse else range(T)
        for t in order:
            gates = x[t] @ wih + h @ whh + b
            i_g = jax.nn.sigmoid(gates[:, 0 * H:1 * H])
            f_g = jax.nn.sigmoid(gates[:, 1 * H:2 * H])
            g_g = jnp.tanh(gates[:, 2 * H:3 * H])
            o_g = jax.nn.sigmoid(gates[:, 3 * H:4 * H])
            c_new = f_g * c + i_g * g_g
            h_new = o_g * jnp.tanh(c_new)
            m = lens > t
            h = jnp.where(m, h_new, h)
            c = jnp.where(m, c_new, c)
            outs[t] = jnp.where(m, h_new, 0.0)
        return jnp.stack(outs)                               # (T, B, H)

    hf = run_dir(params["wih_f"], params["whh_f"], params["b_f"], False)
    hb = run_dir(params["wih_b"], params["whh_b"], params["b_b"], True)
    feats = jnp.concatenate([hf, hb], axis=-1).reshape(T * B, NUM_DIRS * H)
    logits = feats @ params["wtag"] + params["btag"]
    lp = jax.nn.log_softmax(logits, axis=-1)
    return lp.reshape(T, B, K).transpose(1, 0, 2)


def init_params(key, initrange=0.2):
    ks = jax.random.split(key, 12)
    u = lambda k, shape: jax.random.uniform(k, shape, jnp.float32, -initrange, initrange)
    params = {
        "embedding": u(ks[0], (VOCAB, E)),
        # forward direction: stored transposed for x @ W, PyTorch gate order i,f,g,o
        "wih_f": u(ks[1], (E, 4 * H)),
        "whh_f": u(ks[2], (H, 4 * H)),
        "b_f": u(ks[3], (1, 4 * H)) + u(ks[4], (1, 4 * H)),   # b_ih + b_hh
        # backward direction
        "wih_b": u(ks[5], (E, 4 * H)),
        "whh_b": u(ks[6], (H, 4 * H)),
        "b_b": u(ks[7], (1, 4 * H)) + u(ks[8], (1, 4 * H)),
        # hidden2tag
        "wtag": u(ks[9], (NUM_DIRS * H, K)),
        "btag": u(ks[10], (1, K)),
    }
    return params


if __name__ == "__main__":
    key = jax.random.PRNGKey(0)
    pkey, skey = jax.random.split(key)
    params = init_params(pkey)

    sentences = jax.random.randint(skey, (B, T), 0, VOCAB, dtype=jnp.int32)
    lengths = jnp.array([8, 5], dtype=jnp.int32)   # sorted descending, as pack_padded requires

    tag_scores = lstm_tagger_forward(sentences, lengths, params)
    jax.block_until_ready(tag_scores)

    assert tag_scores.shape == (B, T, K)
    # log_softmax rows must (approximately) exponentiate-sum to 1
    row_sums = jnp.sum(jnp.exp(tag_scores), axis=-1)
    assert bool(jnp.all(jnp.abs(row_sums - 1.0) < 1e-4))

    # cross-check against pure-JAX reference (sigmoid-via-tanh rewrite -> few-ULP shift)
    ref = reference_forward(sentences, lengths, params)
    assert bool(jnp.all(jnp.abs(tag_scores - ref) < 2e-4))

    print("KERNEL_OK")
</pallas_src>

<mosaic_0001>
module attributes {stable_mosaic.version = 11 : i64} {
  func.func @lstm_tagger_kernel(%arg0: memref<64x1xi32, #tpu.memory_space<vmem>>, %arg1: memref<8x1xi32, #tpu.memory_space<vmem>>, %arg2: memref<128x32xf32, #tpu.memory_space<vmem>>, %arg3: memref<32x256xf32, #tpu.memory_space<vmem>>, %arg4: memref<1x256xf32, #tpu.memory_space<vmem>>, %arg5: memref<64x256xf32, #tpu.memory_space<vmem>>, %arg6: memref<64x128xf32, #tpu.memory_space<vmem>>, %arg7: memref<1x128xf32, #tpu.memory_space<vmem>>, %arg8: memref<64x128xf32, #tpu.memory_space<vmem>>) attributes {dimension_semantics = [], scalar_prefetch = 0 : i64, scratch_operands = 0 : i64, tpu.core_type = #tpu.core_type<tc>} {
    %c0 = arith.constant 0 : index
    %c0_0 = arith.constant 0 : index
    %0 = vector.load %arg0[%c0, %c0_0] : memref<64x1xi32, #tpu.memory_space<vmem>>, vector<64x1xi32>
    %1 = tpu.iota {dimensions = array<i32: 1>} : vector<64x128xi32>
    %2 = vector.broadcast %0 : vector<64x1xi32> to vector<64x128xi32>
    %3 = arith.cmpi eq, %1, %2 : vector<64x128xi32>
    %4 = arith.extui %3 : vector<64x128xi1> to vector<64x128xi32>
    %5 = arith.sitofp %4 : vector<64x128xi32> to vector<64x128xf32>
    %c0_1 = arith.constant 0 : index
    %c0_2 = arith.constant 0 : index
    %6 = vector.load %arg2[%c0_1, %c0_2] : memref<128x32xf32, #tpu.memory_space<vmem>>, vector<128x32xf32>
    %cst = arith.constant dense<0.000000e+00> : vector<64x32xf32>
    %7 = tpu.matmul %5, %6, %cst {dimension_numbers = #tpu.dot_dimension_numbers<[1], [0], [0], [1], [0, 0, 1, 1], [], []>} : vector<64x128xf32>, vector<128x32xf32>, vector<64x32xf32> -> vector<64x32xf32>
    %c0_3 = arith.constant 0 : index
    %c0_4 = arith.constant 0 : index
    %8 = vector.load %arg3[%c0_3, %c0_4] : memref<32x256xf32, #tpu.memory_space<vmem>>, vector<32x256xf32>
    %cst_5 = arith.constant dense<0.000000e+00> : vector<64x256xf32>
    %9 = tpu.matmul %7, %8, %cst_5 {dimension_numbers = #tpu.dot_dimension_numbers<[1], [0], [0], [1], [0, 0, 1, 1], [], []>} : vector<64x32xf32>, vector<32x256xf32>, vector<64x256xf32> -> vector<64x256xf32>
    %c0_6 = arith.constant 0 : index
    %c0_7 = arith.constant 0 : index
    %10 = vector.load %arg4[%c0_6, %c0_7] : memref<1x256xf32, #tpu.memory_space<vmem>>, vector<1x256xf32>
    %11 = vector.broadcast %10 : vector<1x256xf32> to vector<64x256xf32>
    %12 = arith.addf %9, %11 : vector<64x256xf32>
    %13 = tpu.iota {dimensions = array<i32: 1>} : vector<8x256xi32>
    %c128_i32 = arith.constant 128 : i32
    %14 = vector.broadcast %c128_i32 : i32 to vector<8x256xi32>
    %15 = arith.cmpi sge, %13, %14 : vector<8x256xi32>
    %c192_i32 = arith.constant 192 : i32
    %16 = vector.broadcast %c192_i32 : i32 to vector<8x256xi32>
    %17 = arith.cmpi slt, %13, %16 : vector<8x256xi32>
    %18 = arith.andi %15, %17 : vector<8x256xi1>
    %c64_i32 = arith.constant 64 : i32
    %c0_i32 = arith.constant 0 : i32
    %19 = arith.cmpi eq, %c64_i32, %c0_i32 : i32
    %c1_i32 = arith.constant 1 : i32
    %20 = arith.select %19, %c1_i32, %c64_i32 : i32
    %21 = vector.broadcast %20 : i32 to vector<8x256xi32>
    %22 = arith.remsi %13, %21 : vector<8x256xi32>
    %c0_i32_8 = arith.constant 0 : i32
    %23 = vector.broadcast %c0_i32_8 : i32 to vector<8x256xi32>
    %24 = arith.cmpi ne, %22, %23 : vector<8x256xi32>
    %c0_i32_9 = arith.constant 0 : i32
    %25 = vector.broadcast %c0_i32_9 : i32 to vector<8x256xi32>
    %26 = arith.cmpi slt, %22, %25 : vector<8x256xi32>
    %c0_i32_10 = arith.constant 0 : i32
    %27 = arith.cmpi slt, %20, %c0_i32_10 : i32
    %28 = vector.broadcast %27 : i1 to vector<8x256xi1>
    %29 = vector.broadcast %28 : vector<8x256xi1> to vector<8x256xi1>
    %30 = arith.xori %26, %29 : vector<8x256xi1>
    %31 = arith.andi %30, %24 : vector<8x256xi1>
    %32 = vector.broadcast %20 : i32 to vector<8x256xi32>
    %33 = arith.addi %22, %32 : vector<8x256xi32>
    %34 = arith.select %31, %33, %22 : vector<8x256xi1>, vector<8x256xi32>
    %c32_i32 = arith.constant 32 : i32
    %35 = vector.broadcast %c32_i32 : i32 to vector<8x256xi32>
    %36 = arith.cmpi slt, %34, %35 : vector<8x256xi32>
    %cst_11 = arith.constant 1.000000e+00 : f32
    %cst_12 = arith.constant 5.000000e-01 : f32
    %37 = vector.broadcast %cst_11 : f32 to vector<8x256xf32>
    %38 = vector.broadcast %cst_12 : f32 to vector<8x256xf32>
    %39 = arith.select %18, %37, %38 : vector<8x256xi1>, vector<8x256xf32>
    %c0_13 = arith.constant 0 : index
    %c0_14 = arith.constant 0 : index
    %40 = vector.load %arg1[%c0_13, %c0_14] : memref<8x1xi32, #tpu.memory_space<vmem>>, vector<8x1xi32>
    %41 = tpu.iota {dimensions = array<i32: 1>} : vector<8x64xi32>
    %c32_i32_15 = arith.constant 32 : i32
    %42 = vector.broadcast %c32_i32_15 : i32 to vector<8x64xi32>
    %43 = arith.cmpi slt, %41, %42 : vector<8x64xi32>
    %c0_i32_16 = arith.constant 0 : i32
    %c7_i32 = arith.constant 7 : i32
    %44 = vector.broadcast %c0_i32_16 : i32 to vector<8x64xi32>
    %45 = vector.broadcast %c7_i32 : i32 to vector<8x64xi32>
    %46 = arith.select %43, %44, %45 : vector<8x64xi1>, vector<8x64xi32>
    %47 = vector.broadcast %40 : vector<8x1xi32> to vector<8x64xi32>
    %48 = arith.cmpi sgt, %47, %46 : vector<8x64xi32>
    %c32_i32_17 = arith.constant 32 : i32
    %49 = vector.broadcast %c32_i32_17 : i32 to vector<8x64xi32>
    %50 = arith.cmpi slt, %41, %49 : vector<8x64xi32>
    %c1_i32_18 = arith.constant 1 : i32
    %c6_i32 = arith.constant 6 : i32
    %51 = vector.broadcast %c1_i32_18 : i32 to vector<8x64xi32>
    %52 = vector.broadcast %c6_i32 : i32 to vector<8x64xi32>
    %53 = arith.select %50, %51, %52 : vector<8x64xi1>, vector<8x64xi32>
    %54 = vector.broadcast %40 : vector<8x1xi32> to vector<8x64xi32>
    %55 = arith.cmpi sgt, %54, %53 : vector<8x64xi32>
    %c32_i32_19 = arith.constant 32 : i32
    %56 = vector.broadcast %c32_i32_19 : i32 to vector<8x64xi32>
    %57 = arith.cmpi slt, %41, %56 : vector<8x64xi32>
    %c2_i32 = arith.constant 2 : i32
    %c5_i32 = arith.constant 5 : i32
    %58 = vector.broadcast %c2_i32 : i32 to vector<8x64xi32>
    %59 = vector.broadcast %c5_i32 : i32 to vector<8x64xi32>
    %60 = arith.select %57, %58, %59 : vector<8x64xi1>, vector<8x64xi32>
    %61 = vector.broadcast %40 : vector<8x1xi32> to vector<8x64xi32>
    %62 = arith.cmpi sgt, %61, %60 : vector<8x64xi32>
    %c32_i32_20 = arith.constant 32 : i32
    %63 = vector.broadcast %c32_i32_20 : i32 to vector<8x64xi32>
    %64 = arith.cmpi slt, %41, %63 : vector<8x64xi32>
    %c3_i32 = arith.constant 3 : i32
    %c4_i32 = arith.constant 4 : i32
    %65 = vector.broadcast %c3_i32 : i32 to vector<8x64xi32>
    %66 = vector.broadcast %c4_i32 : i32 to vector<8x64xi32>
    %67 = arith.select %64, %65, %66 : vector<8x64xi1>, vector<8x64xi32>
    %68 = vector.broadcast %40 : vector<8x1xi32> to vector<8x64xi32>
    %69 = arith.cmpi sgt, %68, %67 : vector<8x64xi32>
    %c32_i32_21 = arith.constant 32 : i32
    %70 = vector.broadcast %c32_i32_21 : i32 to vector<8x64xi32>
    %71 = arith.cmpi slt, %41, %70 : vector<8x64xi32>
    %c4_i32_22 = arith.constant 4 : i32
    %c3_i32_23 = arith.constant 3 : i32
    %72 = vector.broadcast %c4_i32_22 : i32 to vector<8x64xi32>
    %73 = vector.broadcast %c3_i32_23 : i32 to vector<8x64xi32>
    %74 = arith.select %71, %72, %73 : vector<8x64xi1>, vector<8x64xi32>
    %75 = vector.broadcast %40 : vector<8x1xi32> to vector<8x64xi32>
    %76 = arith.cmpi sgt, %75, %74 : vector<8x64xi32>
    %c32_i32_24 = arith.constant 32 : i32
    %77 = vector.broadcast %c32_i32_24 : i32 to vector<8x64xi32>
    %78 = arith.cmpi slt, %41, %77 : vector<8x64xi32>
    %c5_i32_25 = arith.constant 5 : i32
    %c2_i32_26 = arith.constant 2 : i32
    %79 = vector.broadcast %c5_i32_25 : i32 to vector<8x64xi32>
    %80 = vector.broadcast %c2_i32_26 : i32 to vector<8x64xi32>
    %81 = arith.select %78, %79, %80 : vector<8x64xi1>, vector<8x64xi32>
    %82 = vector.broadcast %40 : vector<8x1xi32> to vector<8x64xi32>
    %83 = arith.cmpi sgt, %82, %81 : vector<8x64xi32>
    %c32_i32_27 = arith.constant 32 : i32
    %84 = vector.broadcast %c32_i32_27 : i32 to vector<8x64xi32>
    %85 = arith.cmpi slt, %41, %84 : vector<8x64xi32>
    %c6_i32_28 = arith.constant 6 : i32
    %c1_i32_29 = arith.constant 1 : i32
    %86 = vector.broadcast %c6_i32_28 : i32 to vector<8x64xi32>
    %87 = vector.broadcast %c1_i32_29 : i32 to vector<8x64xi32>
    %88 = arith.select %85, %86, %87 : vector<8x64xi1>, vector<8x64xi32>
    %89 = vector.broadcast %40 : vector<8x1xi32> to vector<8x64xi32>
    %90 = arith.cmpi sgt, %89, %88 : vector<8x64xi32>
    %c32_i32_30 = arith.constant 32 : i32
    %91 = vector.broadcast %c32_i32_30 : i32 to vector<8x64xi32>
    %92 = arith.cmpi slt, %41, %91 : vector<8x64xi32>
    %c7_i32_31 = arith.constant 7 : i32
    %c0_i32_32 = arith.constant 0 : i32
    %93 = vector.broadcast %c7_i32_31 : i32 to vector<8x64xi32>
    %94 = vector.broadcast %c0_i32_32 : i32 to vector<8x64xi32>
    %95 = arith.select %92, %93, %94 : vector<8x64xi1>, vector<8x64xi32>
    %96 = vector.broadcast %40 : vector<8x1xi32> to vector<8x64xi32>
    %97 = arith.cmpi sgt, %96, %95 : vector<8x64xi32>
    %c0_33 = arith.constant 0 : index
    %c0_34 = arith.constant 0 : index
    %98 = vector.load %arg5[%c0_33, %c0_34] : memref<64x256xf32, #tpu.memory_space<vmem>>, vector<64x256xf32>
    %cst_35 = arith.constant 0.000000e+00 : f32
    %99 = vector.broadcast %cst_35 : f32 to vector<8x64xf32>
    %cst_36 = arith.constant 0.000000e+00 : f32
    %100 = vector.broadcast %cst_36 : f32 to vector<8x64xf32>
    %101 = vector.extract_strided_slice %12 {offsets = [0, 0], sizes = [8, 256], strides = [1, 1]} : vector<64x256xf32> to vector<8x256xf32>
    %102 = vector.extract_strided_slice %12 {offsets = [56, 0], sizes = [8, 256], strides = [1, 1]} : vector<64x256xf32> to vector<8x256xf32>
    %103 = arith.select %36, %101, %102 : vector<8x256xi1>, vector<8x256xf32>
    %cst_37 = arith.constant dense<0.000000e+00> : vector<8x256xf32>
    %104 = tpu.matmul %99, %98, %cst_37 {dimension_numbers = #tpu.dot_dimension_numbers<[1], [0], [0], [1], [0, 0, 1, 1], [], []>} : vector<8x64xf32>, vector<64x256xf32>, vector<8x256xf32> -> vector<8x256xf32>
    %105 = arith.addf %103, %104 : vector<8x256xf32>
    %106 = arith.mulf %105, %39 : vector<8x256xf32>
    %107 = math.tanh %106 : vector<8x256xf32>
    %cst_38 = arith.constant 1.000000e+00 : f32
    %108 = vector.broadcast %cst_38 : f32 to vector<8x256xf32>
    %109 = arith.addf %107, %108 : vector<8x256xf32>
    %cst_39 = arith.constant 5.000000e-01 : f32
    %110 = vector.broadcast %cst_39 : f32 to vector<8x256xf32>
    %111 = arith.mulf %110, %109 : vector<8x256xf32>
    %112 = arith.select %18, %107, %111 : vector<8x256xi1>, vector<8x256xf32>
    %113 = vector.extract_strided_slice %112 {offsets = [0, 0], sizes = [8, 64], strides = [1, 1]} : vector<8x256xf32> to vector<8x64xf32>
    %114 = vector.extract_strided_slice %112 {offsets = [0, 64], sizes = [8, 64], strides = [1, 1]} : vector<8x256xf32> to vector<8x64xf32>
    %115 = vector.extract_strided_slice %112 {offsets = [0, 128], sizes = [8, 64], strides = [1, 1]} : vector<8x256xf32> to vector<8x64xf32>
    %116 = vector.extract_strided_slice %112 {offsets = [0, 192], sizes = [8, 64], strides = [1, 1]} : vector<8x256xf32> to vector<8x64xf32>
    %117 = arith.mulf %114, %100 : vector<8x64xf32>
    %118 = arith.mulf %113, %115 : vector<8x64xf32>
    %119 = arith.addf %117, %118 : vector<8x64xf32>
    %120 = math.tanh %119 : vector<8x64xf32>
    %121 = arith.mulf %116, %120 : vector<8x64xf32>
    %cst_40 = arith.constant 0.000000e+00 : f32
    %122 = vector.broadcast %cst_40 : f32 to vector<8x64xf32>
    %123 = arith.select %48, %121, %122 : vector<8x64xi1>, vector<8x64xf32>
    %124 = vector.extract_strided_slice %123 {offsets = [0, 0], sizes = [8, 32], strides = [1, 1]} : vector<8x64xf32> to vector<8x32xf32>
    %125 = vector.extract_strided_slice %123 {offsets = [0, 32], sizes = [8, 32], strides = [1, 1]} : vector<8x64xf32> to vector<8x32xf32>
    %126 = arith.select %48, %121, %99 : vector<8x64xi1>, vector<8x64xf32>
    %127 = arith.select %48, %119, %100 : vector<8x64xi1>, vector<8x64xf32>
    %128 = vector.extract_strided_slice %12 {offsets = [8, 0], sizes = [8, 256], strides = [1, 1]} : vector<64x256xf32> to vector<8x256xf32>
    %129 = vector.extract_strided_slice %12 {offsets = [48, 0], sizes = [8, 256], strides = [1, 1]} : vector<64x256xf32> to vector<8x256xf32>
    %130 = arith.select %36, %128, %129 : vector<8x256xi1>, vector<8x256xf32>
    %cst_41 = arith.constant dense<0.000000e+00> : vector<8x256xf32>
    %131 = tpu.matmul %126, %98, %cst_41 {dimension_numbers = #tpu.dot_dimension_numbers<[1], [0], [0], [1], [0, 0, 1, 1], [], []>} : vector<8x64xf32>, vector<64x256xf32>, vector<8x256xf32> -> vector<8x256xf32>
    %132 = arith.addf %130, %131 : vector<8x256xf32>
    %133 = arith.mulf %132, %39 : vector<8x256xf32>
    %134 = math.tanh %133 : vector<8x256xf32>
    %cst_42 = arith.constant 1.000000e+00 : f32
    %135 = vector.broadcast %cst_42 : f32 to vector<8x256xf32>
    %136 = arith.addf %134, %135 : vector<8x256xf32>
    %cst_43 = arith.constant 5.000000e-01 : f32
    %137 = vector.broadcast %cst_43 : f32 to vector<8x256xf32>
    %138 = arith.mulf %137, %136 : vector<8x256xf32>
    %139 = arith.select %18, %134, %138 : vector<8x256xi1>, vector<8x256xf32>
    %140 = vector.extract_strided_slice %139 {offsets = [0, 0], sizes = [8, 64], strides = [1, 1]} : vector<8x256xf32> to vector<8x64xf32>
    %141 = vector.extract_strided_slice %139 {offsets = [0, 64], sizes = [8, 64], strides = [1, 1]} : vector<8x256xf32> to vector<8x64xf32>
    %142 = vector.extract_strided_slice %139 {offsets = [0, 128], sizes = [8, 64], strides = [1, 1]} : vector<8x256xf32> to vector<8x64xf32>
    %143 = vector.extract_strided_slice %139 {offsets = [0, 192], sizes = [8, 64], strides = [1, 1]} : vector<8x256xf32> to vector<8x64xf32>
    %144 = arith.mulf %141, %127 : vector<8x64xf32>
    %145 = arith.mulf %140, %142 : vector<8x64xf32>
    %146 = arith.addf %144, %145 : vector<8x64xf32>
    %147 = math.tanh %146 : vector<8x64xf32>
    %148 = arith.mulf %143, %147 : vector<8x64xf32>
    %cst_44 = arith.constant 0.000000e+00 : f32
    %149 = vector.broadcast %cst_44 : f32 to vector<8x64xf32>
    %150 = arith.select %55, %148, %149 : vector<8x64xi1>, vector<8x64xf32>
    %151 = vector.extract_strided_slice %150 {offsets = [0, 0], sizes = [8, 32], strides = [1, 1]} : vector<8x64xf32> to vector<8x32xf32>
    %152 = vector.extract_strided_slice %150 {offsets = [0, 32], sizes = [8, 32], strides = [1, 1]} : vector<8x64xf32> to vector<8x32xf32>
    %153 = arith.select %55, %148, %126 : vector<8x64xi1>, vector<8x64xf32>
    %154 = arith.select %55, %146, %127 : vector<8x64xi1>, vector<8x64xf32>
    %155 = vector.extract_strided_slice %12 {offsets = [16, 0], sizes = [8, 256], strides = [1, 1]} : vector<64x256xf32> to vector<8x256xf32>
    %156 = vector.extract_strided_slice %12 {offsets = [40, 0], sizes = [8, 256], strides = [1, 1]} : vector<64x256xf32> to vector<8x256xf32>
    %157 = arith.select %36, %155, %156 : vector<8x256xi1>, vector<8x256xf32>
    %cst_45 = arith.constant dense<0.000000e+00> : vector<8x256xf32>
    %158 = tpu.matmul %153, %98, %cst_45 {dimension_numbers = #tpu.dot_dimension_numbers<[1], [0], [0], [1], [0, 0, 1, 1], [], []>} : vector<8x64xf32>, vector<64x256xf32>, vector<8x256xf32> -> vector<8x256xf32>
    %159 = arith.addf %157, %158 : vector<8x256xf32>
    %160 = arith.mulf %159, %39 : vector<8x256xf32>
    %161 = math.tanh %160 : vector<8x256xf32>
    %cst_46 = arith.constant 1.000000e+00 : f32
    %162 = vector.broadcast %cst_46 : f32 to vector<8x256xf32>
    %163 = arith.addf %161, %162 : vector<8x256xf32>
    %cst_47 = arith.constant 5.000000e-01 : f32
    %164 = vector.broadcast %cst_47 : f32 to vector<8x256xf32>
    %165 = arith.mulf %164, %163 : vector<8x256xf32>
    %166 = arith.select %18, %161, %165 : vector<8x256xi1>, vector<8x256xf32>
    %167 = vector.extract_strided_slice %166 {offsets = [0, 0], sizes = [8, 64], strides = [1, 1]} : vector<8x256xf32> to vector<8x64xf32>
    %168 = vector.extract_strided_slice %166 {offsets = [0, 64], sizes = [8, 64], strides = [1, 1]} : vector<8x256xf32> to vector<8x64xf32>
    %169 = vector.extract_strided_slice %166 {offsets = [0, 128], sizes = [8, 64], strides = [1, 1]} : vector<8x256xf32> to vector<8x64xf32>
    %170 = vector.extract_strided_slice %166 {offsets = [0, 192], sizes = [8, 64], strides = [1, 1]} : vector<8x256xf32> to vector<8x64xf32>
    %171 = arith.mulf %168, %154 : vector<8x64xf32>
    %172 = arith.mulf %167, %169 : vector<8x64xf32>
    %173 = arith.addf %171, %172 : vector<8x64xf32>
    %174 = math.tanh %173 : vector<8x64xf32>
    %175 = arith.mulf %170, %174 : vector<8x64xf32>
    %cst_48 = arith.constant 0.000000e+00 : f32
    %176 = vector.broadcast %cst_48 : f32 to vector<8x64xf32>
    %177 = arith.select %62, %175, %176 : vector<8x64xi1>, vector<8x64xf32>
    %178 = vector.extract_strided_slice %177 {offsets = [0, 0], sizes = [8, 32], strides = [1, 1]} : vector<8x64xf32> to vector<8x32xf32>
    %179 = vector.extract_strided_slice %177 {offsets = [0, 32], sizes = [8, 32], strides = [1, 1]} : vector<8x64xf32> to vector<8x32xf32>
    %180 = arith.select %62, %175, %153 : vector<8x64xi1>, vector<8x64xf32>
    %181 = arith.select %62, %173, %154 : vector<8x64xi1>, vector<8x64xf32>
    %182 = vector.extract_strided_slice %12 {offsets = [24, 0], sizes = [8, 256], strides = [1, 1]} : vector<64x256xf32> to vector<8x256xf32>
    %183 = vector.extract_strided_slice %12 {offsets = [32, 0], sizes = [8, 256], strides = [1, 1]} : vector<64x256xf32> to vector<8x256xf32>
    %184 = arith.select %36, %182, %183 : vector<8x256xi1>, vector<8x256xf32>
    %cst_49 = arith.constant dense<0.000000e+00> : vector<8x256xf32>
    %185 = tpu.matmul %180, %98, %cst_49 {dimension_numbers = #tpu.dot_dimension_numbers<[1], [0], [0], [1], [0, 0, 1, 1], [], []>} : vector<8x64xf32>, vector<64x256xf32>, vector<8x256xf32> -> vector<8x256xf32>
    %186 = arith.addf %184, %185 : vector<8x256xf32>
    %187 = arith.mulf %186, %39 : vector<8x256xf32>
    %188 = math.tanh %187 : vector<8x256xf32>
    %cst_50 = arith.constant 1.000000e+00 : f32
    %189 = vector.broadcast %cst_50 : f32 to vector<8x256xf32>
    %190 = arith.addf %188, %189 : vector<8x256xf32>
    %cst_51 = arith.constant 5.000000e-01 : f32
    %191 = vector.broadcast %cst_51 : f32 to vector<8x256xf32>
    %192 = arith.mulf %191, %190 : vector<8x256xf32>
    %193 = arith.select %18, %188, %192 : vector<8x256xi1>, vector<8x256xf32>
    %194 = vector.extract_strided_slice %193 {offsets = [0, 0], sizes = [8, 64], strides = [1, 1]} : vector<8x256xf32> to vector<8x64xf32>
    %195 = vector.extract_strided_slice %193 {offsets = [0, 64], sizes = [8, 64], strides = [1, 1]} : vector<8x256xf32> to vector<8x64xf32>
    %196 = vector.extract_strided_slice %193 {offsets = [0, 128], sizes = [8, 64], strides = [1, 1]} : vector<8x256xf32> to vector<8x64xf32>
    %197 = vector.extract_strided_slice %193 {offsets = [0, 192], sizes = [8, 64], strides = [1, 1]} : vector<8x256xf32> to vector<8x64xf32>
    %198 = arith.mulf %195, %181 : vector<8x64xf32>
    %199 = arith.mulf %194, %196 : vector<8x64xf32>
    %200 = arith.addf %198, %199 : vector<8x64xf32>
    %201 = math.tanh %200 : vector<8x64xf32>
    %202 = arith.mulf %197, %201 : vector<8x64xf32>
    %cst_52 = arith.constant 0.000000e+00 : f32
    %203 = vector.broadcast %cst_52 : f32 to vector<8x64xf32>
    %204 = arith.select %69, %202, %203 : vector<8x64xi1>, vector<8x64xf32>
    %205 = vector.extract_strided_slice %204 {offsets = [0, 0], sizes = [8, 32], strides = [1, 1]} : vector<8x64xf32> to vector<8x32xf32>
    %206 = vector.extract_strided_slice %204 {offsets = [0, 32], sizes = [8, 32], strides = [1, 1]} : vector<8x64xf32> to vector<8x32xf32>
    %207 = arith.select %69, %202, %180 : vector<8x64xi1>, vector<8x64xf32>
    %208 = arith.select %69, %200, %181 : vector<8x64xi1>, vector<8x64xf32>
    %209 = vector.extract_strided_slice %12 {offsets = [32, 0], sizes = [8, 256], strides = [1, 1]} : vector<64x256xf32> to vector<8x256xf32>
    %210 = vector.extract_strided_slice %12 {offsets = [24, 0], sizes = [8, 256], strides = [1, 1]} : vector<64x256xf32> to vector<8x256xf32>
    %211 = arith.select %36, %209, %210 : vector<8x256xi1>, vector<8x256xf32>
    %cst_53 = arith.constant dense<0.000000e+00> : vector<8x256xf32>
    %212 = tpu.matmul %207, %98, %cst_53 {dimension_numbers = #tpu.dot_dimension_numbers<[1], [0], [0], [1], [0, 0, 1, 1], [], []>} : vector<8x64xf32>, vector<64x256xf32>, vector<8x256xf32> -> vector<8x256xf32>
    %213 = arith.addf %211, %212 : vector<8x256xf32>
    %214 = arith.mulf %213, %39 : vector<8x256xf32>
    %215 = math.tanh %214 : vector<8x256xf32>
    %cst_54 = arith.constant 1.000000e+00 : f32
    %216 = vector.broadcast %cst_54 : f32 to vector<8x256xf32>
    %217 = arith.addf %215, %216 : vector<8x256xf32>
    %cst_55 = arith.constant 5.000000e-01 : f32
    %218 = vector.broadcast %cst_55 : f32 to vector<8x256xf32>
    %219 = arith.mulf %218, %217 : vector<8x256xf32>
    %220 = arith.select %18, %215, %219 : vector<8x256xi1>, vector<8x256xf32>
    %221 = vector.extract_strided_slice %220 {offsets = [0, 0], sizes = [8, 64], strides = [1, 1]} : vector<8x256xf32> to vector<8x64xf32>
    %222 = vector.extract_strided_slice %220 {offsets = [0, 64], sizes = [8, 64], strides = [1, 1]} : vector<8x256xf32> to vector<8x64xf32>
    %223 = vector.extract_strided_slice %220 {offsets = [0, 128], sizes = [8, 64], strides = [1, 1]} : vector<8x256xf32> to vector<8x64xf32>
    %224 = vector.extract_strided_slice %220 {offsets = [0, 192], sizes = [8, 64], strides = [1, 1]} : vector<8x256xf32> to vector<8x64xf32>
    %225 = arith.mulf %222, %208 : vector<8x64xf32>
    %226 = arith.mulf %221, %223 : vector<8x64xf32>
    %227 = arith.addf %225, %226 : vector<8x64xf32>
    %228 = math.tanh %227 : vector<8x64xf32>
    %229 = arith.mulf %224, %228 : vector<8x64xf32>
    %cst_56 = arith.constant 0.000000e+00 : f32
    %230 = vector.broadcast %cst_56 : f32 to vector<8x64xf32>
    %231 = arith.select %76, %229, %230 : vector<8x64xi1>, vector<8x64xf32>
    %232 = vector.extract_strided_slice %231 {offsets = [0, 0], sizes = [8, 32], strides = [1, 1]} : vector<8x64xf32> to vector<8x32xf32>
    %233 = vector.extract_strided_slice %231 {offsets = [0, 32], sizes = [8, 32], strides = [1, 1]} : vector<8x64xf32> to vector<8x32xf32>
    %234 = arith.select %76, %229, %207 : vector<8x64xi1>, vector<8x64xf32>
    %235 = arith.select %76, %227, %208 : vector<8x64xi1>, vector<8x64xf32>
    %236 = vector.extract_strided_slice %12 {offsets = [40, 0], sizes = [8, 256], strides = [1, 1]} : vector<64x256xf32> to vector<8x256xf32>
    %237 = vector.extract_strided_slice %12 {offsets = [16, 0], sizes = [8, 256], strides = [1, 1]} : vector<64x256xf32> to vector<8x256xf32>
    %238 = arith.select %36, %236, %237 : vector<8x256xi1>, vector<8x256xf32>
    %cst_57 = arith.constant dense<0.000000e+00> : vector<8x256xf32>
    %239 = tpu.matmul %234, %98, %cst_57 {dimension_numbers = #tpu.dot_dimension_numbers<[1], [0], [0], [1], [0, 0, 1, 1], [], []>} : vector<8x64xf32>, vector<64x256xf32>, vector<8x256xf32> -> vector<8x256xf32>
    %240 = arith.addf %238, %239 : vector<8x256xf32>
    %241 = arith.mulf %240, %39 : vector<8x256xf32>
    %242 = math.tanh %241 : vector<8x256xf32>
    %cst_58 = arith.constant 1.000000e+00 : f32
    %243 = vector.broadcast %cst_58 : f32 to vector<8x256xf32>
    %244 = arith.addf %242, %243 : vector<8x256xf32>
    %cst_59 = arith.constant 5.000000e-01 : f32
    %245 = vector.broadcast %cst_59 : f32 to vector<8x256xf32>
    %246 = arith.mulf %245, %244 : vector<8x256xf32>
    %247 = arith.select %18, %242, %246 : vector<8x256xi1>, vector<8x256xf32>
    %248 = vector.extract_strided_slice %247 {offsets = [0, 0], sizes = [8, 64], strides = [1, 1]} : vector<8x256xf32> to vector<8x64xf32>
    %249 = vector.extract_strided_slice %247 {offsets = [0, 64], sizes = [8, 64], strides = [1, 1]} : vector<8x256xf32> to vector<8x64xf32>
    %250 = vector.extract_strided_slice %247 {offsets = [0, 128], sizes = [8, 64], strides = [1, 1]} : vector<8x256xf32> to vector<8x64xf32>
    %251 = vector.extract_strided_slice %247 {offsets = [0, 192], sizes = [8, 64], strides = [1, 1]} : vector<8x256xf32> to vector<8x64xf32>
    %252 = arith.mulf %249, %235 : vector<8x64xf32>
    %253 = arith.mulf %248, %250 : vector<8x64xf32>
    %254 = arith.addf %252, %253 : vector<8x64xf32>
    %255 = math.tanh %254 : vector<8x64xf32>
    %256 = arith.mulf %251, %255 : vector<8x64xf32>
    %cst_60 = arith.constant 0.000000e+00 : f32
    %257 = vector.broadcast %cst_60 : f32 to vector<8x64xf32>
    %258 = arith.select %83, %256, %257 : vector<8x64xi1>, vector<8x64xf32>
    %259 = vector.extract_strided_slice %258 {offsets = [0, 0], sizes = [8, 32], strides = [1, 1]} : vector<8x64xf32> to vector<8x32xf32>
    %260 = vector.extract_strided_slice %258 {offsets = [0, 32], sizes = [8, 32], strides = [1, 1]} : vector<8x64xf32> to vector<8x32xf32>
    %261 = arith.select %83, %256, %234 : vector<8x64xi1>, vector<8x64xf32>
    %262 = arith.select %83, %254, %235 : vector<8x64xi1>, vector<8x64xf32>
    %263 = vector.extract_strided_slice %12 {offsets = [48, 0], sizes = [8, 256], strides = [1, 1]} : vector<64x256xf32> to vector<8x256xf32>
    %264 = vector.extract_strided_slice %12 {offsets = [8, 0], sizes = [8, 256], strides = [1, 1]} : vector<64x256xf32> to vector<8x256xf32>
    %265 = arith.select %36, %263, %264 : vector<8x256xi1>, vector<8x256xf32>
    %cst_61 = arith.constant dense<0.000000e+00> : vector<8x256xf32>
    %266 = tpu.matmul %261, %98, %cst_61 {dimension_numbers = #tpu.dot_dimension_numbers<[1], [0], [0], [1], [0, 0, 1, 1], [], []>} : vector<8x64xf32>, vector<64x256xf32>, vector<8x256xf32> -> vector<8x256xf32>
    %267 = arith.addf %265, %266 : vector<8x256xf32>
    %268 = arith.mulf %267, %39 : vector<8x256xf32>
    %269 = math.tanh %268 : vector<8x256xf32>
    %cst_62 = arith.constant 1.000000e+00 : f32
    %270 = vector.broadcast %cst_62 : f32 to vector<8x256xf32>
    %271 = arith.addf %269, %270 : vector<8x256xf32>
    %cst_63 = arith.constant 5.000000e-01 : f32
    %272 = vector.broadcast %cst_63 : f32 to vector<8x256xf32>
    %273 = arith.mulf %272, %271 : vector<8x256xf32>
    %274 = arith.select %18, %269, %273 : vector<8x256xi1>, vector<8x256xf32>
    %275 = vector.extract_strided_slice %274 {offsets = [0, 0], sizes = [8, 64], strides = [1, 1]} : vector<8x256xf32> to vector<8x64xf32>
    %276 = vector.extract_strided_slice %274 {offsets = [0, 64], sizes = [8, 64], strides = [1, 1]} : vector<8x256xf32> to vector<8x64xf32>
    %277 = vector.extract_strided_slice %274 {offsets = [0, 128], sizes = [8, 64], strides = [1, 1]} : vector<8x256xf32> to vector<8x64xf32>
    %278 = vector.extract_strided_slice %274 {offsets = [0, 192], sizes = [8, 64], strides = [1, 1]} : vector<8x256xf32> to vector<8x64xf32>
    %279 = arith.mulf %276, %262 : vector<8x64xf32>
    %280 = arith.mulf %275, %277 : vector<8x64xf32>
    %281 = arith.addf %279, %280 : vector<8x64xf32>
    %282 = math.tanh %281 : vector<8x64xf32>
    %283 = arith.mulf %278, %282 : vector<8x64xf32>
    %cst_64 = arith.constant 0.000000e+00 : f32
    %284 = vector.broadcast %cst_64 : f32 to vector<8x64xf32>
    %285 = arith.select %90, %283, %284 : vector<8x64xi1>, vector<8x64xf32>
    %286 = vector.extract_strided_slice %285 {offsets = [0, 0], sizes = [8, 32], strides = [1, 1]} : vector<8x64xf32> to vector<8x32xf32>
    %287 = vector.extract_strided_slice %285 {offsets = [0, 32], sizes = [8, 32], strides = [1, 1]} : vector<8x64xf32> to vector<8x32xf32>
    %288 = arith.select %90, %283, %261 : vector<8x64xi1>, vector<8x64xf32>
    %289 = arith.select %90, %281, %262 : vector<8x64xi1>, vector<8x64xf32>
    %290 = vector.extract_strided_slice %12 {offsets = [56, 0], sizes = [8, 256], strides = [1, 1]} : vector<64x256xf32> to vector<8x256xf32>
    %291 = vector.extract_strided_slice %12 {offsets = [0, 0], sizes = [8, 256], strides = [1, 1]} : vector<64x256xf32> to vector<8x256xf32>
    %292 = arith.select %36, %290, %291 : vector<8x256xi1>, vector<8x256xf32>
    %cst_65 = arith.constant dense<0.000000e+00> : vector<8x256xf32>
    %293 = tpu.matmul %288, %98, %cst_65 {dimension_numbers = #tpu.dot_dimension_numbers<[1], [0], [0], [1], [0, 0, 1, 1], [], []>} : vector<8x64xf32>, vector<64x256xf32>, vector<8x256xf32> -> vector<8x256xf32>
    %294 = arith.addf %292, %293 : vector<8x256xf32>
    %295 = arith.mulf %294, %39 : vector<8x256xf32>
    %296 = math.tanh %295 : vector<8x256xf32>
    %cst_66 = arith.constant 1.000000e+00 : f32
    %297 = vector.broadcast %cst_66 : f32 to vector<8x256xf32>
    %298 = arith.addf %296, %297 : vector<8x256xf32>
    %cst_67 = arith.constant 5.000000e-01 : f32
    %299 = vector.broadcast %cst_67 : f32 to vector<8x256xf32>
    %300 = arith.mulf %299, %298 : vector<8x256xf32>
    %301 = arith.select %18, %296, %300 : vector<8x256xi1>, vector<8x256xf32>
    %302 = vector.extract_strided_slice %301 {offsets = [0, 0], sizes = [8, 64], strides = [1, 1]} : vector<8x256xf32> to vector<8x64xf32>
    %303 = vector.extract_strided_slice %301 {offsets = [0, 64], sizes = [8, 64], strides = [1, 1]} : vector<8x256xf32> to vector<8x64xf32>
    %304 = vector.extract_strided_slice %301 {offsets = [0, 128], sizes = [8, 64], strides = [1, 1]} : vector<8x256xf32> to vector<8x64xf32>
    %305 = vector.extract_strided_slice %301 {offsets = [0, 192], sizes = [8, 64], strides = [1, 1]} : vector<8x256xf32> to vector<8x64xf32>
    %306 = arith.mulf %303, %289 : vector<8x64xf32>
    %307 = arith.mulf %302, %304 : vector<8x64xf32>
    %308 = arith.addf %306, %307 : vector<8x64xf32>
    %309 = math.tanh %308 : vector<8x64xf32>
    %310 = arith.mulf %305, %309 : vector<8x64xf32>
    %cst_68 = arith.constant 0.000000e+00 : f32
    %311 = vector.broadcast %cst_68 : f32 to vector<8x64xf32>
    %312 = arith.select %97, %310, %311 : vector<8x64xi1>, vector<8x64xf32>
    %313 = vector.extract_strided_slice %312 {offsets = [0, 0], sizes = [8, 32], strides = [1, 1]} : vector<8x64xf32> to vector<8x32xf32>
    %314 = vector.extract_strided_slice %312 {offsets = [0, 32], sizes = [8, 32], strides = [1, 1]} : vector<8x64xf32> to vector<8x32xf32>
    %315 = tpu.concatenate %124, %314 in 1 : vector<8x32xf32>, vector<8x32xf32> -> vector<8x64xf32>
    %316 = tpu.concatenate %151, %287 in 1 : vector<8x32xf32>, vector<8x32xf32> -> vector<8x64xf32>
    %317 = tpu.concatenate %178, %260 in 1 : vector<8x32xf32>, vector<8x32xf32> -> vector<8x64xf32>
    %318 = tpu.concatenate %205, %233 in 1 : vector<8x32xf32>, vector<8x32xf32> -> vector<8x64xf32>
    %319 = tpu.concatenate %232, %206 in 1 : vector<8x32xf32>, vector<8x32xf32> -> vector<8x64xf32>
    %320 = tpu.concatenate %259, %179 in 1 : vector<8x32xf32>, vector<8x32xf32> -> vector<8x64xf32>
    %321 = tpu.concatenate %286, %152 in 1 : vector<8x32xf32>, vector<8x32xf32> -> vector<8x64xf32>
    %322 = tpu.concatenate %313, %125 in 1 : vector<8x32xf32>, vector<8x32xf32> -> vector<8x64xf32>
    %323 = tpu.concatenate %315, %316, %317, %318, %319, %320, %321, %322 in 0 : vector<8x64xf32>, vector<8x64xf32>, vector<8x64xf32>, vector<8x64xf32>, vector<8x64xf32>, vector<8x64xf32>, vector<8x64xf32>, vector<8x64xf32> -> vector<64x64xf32>
    %c0_69 = arith.constant 0 : index
    %c0_70 = arith.constant 0 : index
    %324 = vector.load %arg6[%c0_69, %c0_70] : memref<64x128xf32, #tpu.memory_space<vmem>>, vector<64x128xf32>
    %cst_71 = arith.constant dense<0.000000e+00> : vector<64x128xf32>
    %325 = tpu.matmul %323, %324, %cst_71 {dimension_numbers = #tpu.dot_dimension_numbers<[1], [0], [0], [1], [0, 0, 1, 1], [], []>} : vector<64x64xf32>, vector<64x128xf32>, vector<64x128xf32> -> vector<64x128xf32>
    %c0_72 = arith.constant 0 : index
    %c0_73 = arith.constant 0 : index
    %326 = vector.load %arg7[%c0_72, %c0_73] : memref<1x128xf32, #tpu.memory_space<vmem>>, vector<1x128xf32>
    %327 = vector.broadcast %326 : vector<1x128xf32> to vector<64x128xf32>
    %328 = arith.addf %325, %327 : vector<64x128xf32>
    %cst_74 = arith.constant dense<0xFF800000> : vector<64xf32>
    %329 = vector.multi_reduction <maximumf>, %328, %cst_74 [1] : vector<64x128xf32> to vector<64xf32>
    %330 = vector.shape_cast %329 : vector<64xf32> to vector<64x1xf32>
    %331 = vector.broadcast %330 : vector<64x1xf32> to vector<64x128xf32>
    %332 = arith.subf %328, %331 : vector<64x128xf32>
    %333 = math.exp %332 : vector<64x128xf32>
    %cst_75 = arith.constant dense<0.000000e+00> : vector<64xf32>
    %334 = vector.multi_reduction <add>, %333, %cst_75 [1] : vector<64x128xf32> to vector<64xf32>
    %335 = vector.shape_cast %334 : vector<64xf32> to vector<64x1xf32>
    %336 = math.log %335 : vector<64x1xf32>
    %337 = vector.broadcast %336 : vector<64x1xf32> to vector<64x128xf32>
    %338 = arith.subf %332, %337 : vector<64x128xf32>
    %c0_76 = arith.constant 0 : index
    %c0_77 = arith.constant 0 : index
    %339 = vector.load %arg8[%c0_76, %c0_77] : memref<64x128xf32, #tpu.memory_space<vmem>>, vector<64x128xf32>
    tpu.vector_store %arg8[%c0_76, %c0_77], %338 {strides = array<i32>} : memref<64x128xf32, #tpu.memory_space<vmem>>, vector<64x128xf32>,
    return
  }
}

</mosaic_0001>

<bundles_post_ra>
// kernel: tpu_custom_call.1
= control target key start
LH: loop header
LB: loop body
LE: loop exit
PB: predicated region body
PF: predicated region fallthrough
CT: control target
= control target key end

     0   :  { %13 = vsyncpa [#allocation3], 0  ;;  %s2835_s0 = inlined_call_operand.vmem [shape: s32[64,1], index: 0, kind: input, shape index: {}]   ;;  %s2836_s1 = inlined_call_operand.vmem [shape: s32[8,1], index: 1, kind: input, shape index: {}]   ;;  %s2837_s2 = inlined_call_operand.vmem [shape: f32[128,32], index: 2, kind: input, shape index: {}]   ;;  %s2838_s3 = inlined_call_operand.vmem [shape: f32[32,256], index: 3, kind: input, shape index: {}]   ;;  %s2839_s4 = inlined_call_operand.hbm [shape: f32[1,256], index: 4, kind: input, shape index: {}]   ;;  %s2840_s5 = inlined_call_operand.vmem [shape: f32[64,256], index: 5, kind: input, shape index: {}]   ;;  %s2841_s6 = inlined_call_operand.vmem [shape: f32[64,128], index: 6, kind: input, shape index: {}]   ;;  %s2842_s7 = inlined_call_operand.vmem [shape: f32[1,128], index: 7, kind: input, shape index: {}]   ;;  %s2843_s8 = inlined_call_operand.hbm [shape: f32[64,128], index: 8, kind: output, shape index: {}]  }
   0x1   :  { %14 = vsyncpa [#allocation4], 0  ;;  %s2080_s27 = smov [#allocation2]   ;;  %s2032_s9 = scalar_lea.hbm %s2839_s4, 32 }
   0x2   :  { %s29_s28 = sshll.u32 %s2080_s27, 4  ;;  %p2033_p0 = scmp.ne.s32.totalorder %s2839_s4, %s2032_s9  ;;  %s30_s28 = int_to_ptr.vmem [resolvable:$true] %s29_s28 }
   0x3   :  { %p2036_p1 = scmp.lt.u32.totalorder %s2032_s9, %s2839_s4 }
   0x5   :  { %p2038_p2 = pnand %p2036_p1, %p2033_p0 }
   0x7   :  { %2041 = shalt.err (!%p2038_p2)
}
   0x8   :  { %s2042_s14 = scalar_lea.vmem %s30_s28, 32  ;;  %p2047_p4 = scmp.lt.s32.totalorder %s30_s28, %s30_s28 }
   0x9   :  { %p2043_p3 = scmp.ne.s32.totalorder %s30_s28, %s2042_s14  ;;  %p2048_p5 = scmp.lt.s32.totalorder %s2042_s14, %s2042_s14 }
   0xb   :  { %p2049_p6 = por %p2048_p5, %p2047_p4 }
   0xd   :  { %p2050_p7 = pnand %p2049_p6, %p2043_p3 }
   0xf   :  { %2053 = shalt.err (!%p2050_p7)
}
  0x10   :  { %32 = dma.hbm_to_vmem [thread:$0]  %s2839_s4, 32, %s30_s28, [#allocation3]  }
  0x11   :  { %2076 = dma.done.wait [#allocation3], 32  }
  0x12   :  { %2077 = vsyncadd [#allocation3], 4294967264  ;;  %v2081_v0 = vmov 0   ;;  %v44_v1 = vld [vmem:[%s2835_s0 + $0x10] sm:$0xff]  ;;  %v42_v2 = vld [vmem:[%s2835_s0] sm:$0xff]  ;;  %v50_v20 = vlaneseq  ;;  %v2082_v51 = vmov 1.0  }
  0x13   :  { %1951 = vset.pattern.permute.xlu1 %v2081_v0  ;;  %1950 = vset.pattern.permute.xlu0 %v2081_v0  ;;  %v45_v3 = vld [vmem:[%s2835_s0 + $0x18] sm:$0xff]  ;;  %v43_v4 = vld [vmem:[%s2835_s0 + $0x8] sm:$0xff]  ;;  %v100_v5 = vld [vmem:[%s2837_s2] sm:$0xff]  ;;  %v2083_v58 = vmov 0.0   ;;  %vm241_vm9 = vcmask 261120   ;;  %vm453_vm14 = vcmask 523264  }
  0x14   :  { %59 = vperm.xlu1 %1951, %v44_v1   ;;  %53 = vperm.xlu0 %1950, %v42_v2   ;;  %v101_v6 = vld [vmem:[%s2837_s2 + $0x8] sm:$0xff]  ;;  %v102_v7 = vld [vmem:[%s2837_s2 + $0x10] sm:$0xff]  ;;  %v103_v9 = vld [vmem:[%s2837_s2 + $0x18] sm:$0xff]  ;;  %v2211_v25 = vand.u32 127, %v50_v20 }
  0x15   :  { %v1746_v8 = vpack.c.bf16 %v101_v6, %v100_v5  ;;  %v1750_v10 = vpack.c.bf16 %v103_v9, %v102_v7  ;;  %v104_v11 = vld [vmem:[%s2837_s2 + $0x20] sm:$0xff]  ;;  %v105_v12 = vld [vmem:[%s2837_s2 + $0x28] sm:$0xff]  ;;  %v106_v16 = vld [vmem:[%s2837_s2 + $0x30] sm:$0xff]  ;;  %354 = vmatprep.mubr.f32.mxu1 %v2083_v58 }
  0x16   :  { %v47_v13 = vld [vmem:[%s2835_s0 + $0x28] sm:$0xff]  ;;  %v46_v14 = vld [vmem:[%s2835_s0 + $0x20] sm:$0xff]  ;;  %v1754_v15 = vpack.c.bf16 %v105_v12, %v104_v11  ;;  %v107_v17 = vld [vmem:[%s2837_s2 + $0x38] sm:$0xff]  ;;  %vm415_vm0 = vcmp.lt.s32.totalorder %v2211_v25, 32 }
  0x17   :  { %1747 = vmatprep.subr.bf16.mxu0 %v1746_v8  ;;  %v49_v18 = vld [vmem:[%s2835_s0 + $0x38] sm:$0xff]  ;;  %v48_v19 = vld [vmem:[%s2835_s0 + $0x30] sm:$0xff]  ;;  %v1758_v21 = vpack.c.bf16 %v107_v17, %v106_v16  ;;  %v108_v22 = vld [vmem:[%s2837_s2 + $0x40] sm:$0xff]  ;;  %v2240_v36 = vsel %vm415_vm0, 7, %v2081_v0 }
  0x18   :  { %62 = vperm.xlu1 %1951, %v45_v3   ;;  %56 = vperm.xlu0 %1950, %v43_v4   ;;  %v109_v23 = vld [vmem:[%s2837_s2 + $0x48] sm:$0xff]  ;;  %v414_v24 = vld [vmem:[%s2836_s1] sm:$0xff]  ;;  %v110_v27 = vld [vmem:[%s2837_s2 + $0x50] sm:$0xff] }
  0x19   :  { %1749 = vmatpush3.bf16.msra.mxu0 %v1746_v8  ;;  %v1762_v26 = vpack.c.bf16 %v109_v23, %v108_v22  ;;  %v111_v28 = vld [vmem:[%s2837_s2 + $0x58] sm:$0xff]  ;;  %v222_v29 = vld [vmem:[%s2838_s3 + $0x8] sm:$0xff]  ;;  %v221_v31 = vld [vmem:[%s2838_s3] sm:$0xff] }
  0x1a   :  { %1751 = vmatprep.subr.bf16.mxu0 %v1750_v10  ;;  %v224_v30 = vld [vmem:[%s2838_s3 + $0x18] sm:$0xff]  ;;  %v223_v33 = vld [vmem:[%s2838_s3 + $0x10] sm:$0xff]  ;;  %v226_v34 = vld [vmem:[%s2838_s3 + $0x28] sm:$0xff]  ;;  %v1766_v37 = vpack.c.bf16 %v111_v28, %v110_v27 }
  0x1b   :  { %v1778_v32 = vpack.c.bf16 %v224_v30, %v222_v29  ;;  %v228_v35 = vld [vmem:[%s2838_s3 + $0x38] sm:$0xff]  ;;  %v112_v38 = vld [vmem:[%s2837_s2 + $0x60] sm:$0xff]  ;;  %v1780_v39 = vpack.c.bf16 %v223_v33, %v221_v31  ;;  %v113_v40 = vld [vmem:[%s2837_s2 + $0x68] sm:$0xff]  ;;  %v232_v29 = vshrl.u32 %v50_v20, 7  ;;  %v390_v20 = vand.u32 63, %v2211_v25 }
  0x1c   :  { %68 = vperm.xlu1 %1951, %v47_v13   ;;  %65 = vperm.xlu0 %1950, %v46_v14   ;;  %v1782_v41 = vpack.c.bf16 %v228_v35, %v226_v34  ;;  %v225_v42 = vld [vmem:[%s2838_s3 + $0x20] sm:$0xff]  ;;  %v227_v43 = vld [vmem:[%s2838_s3 + $0x30] sm:$0xff]  ;;  %v1770_v44 = vpack.c.bf16 %v113_v40, %v112_v38  ;;  %v115_v47 = vld [vmem:[%s2837_s2 + $0x78] sm:$0xff] }
  0x1d   :  { %1753 = vmatpush3.bf16.msra.mxu0 %v1750_v10  ;;  %1930 = vmatprep.subr.bf16.mxu1 %v1778_v32  ;;  %v1784_v45 = vpack.c.bf16 %v227_v43, %v225_v42  ;;  %v114_v46 = vld [vmem:[%s2837_s2 + $0x70] sm:$0xff]  ;;  %v436_v59 = vld [vmem:[%s2840_s5 + $0x8] sm:$0xff]  ;;  %v438_v60 = vld [vmem:[%s2840_s5 + $0x18] sm:$0xff]  ;;  %v233_v30 = vsub.s32 0, %v232_v29  ;;  %v237_v33 = vsub.s32 1, %v232_v29  ;;  %vm2396_vm10 = vcmp.lt.s32.totalorder %v390_v20, 32 }
  0x1e   :  { %1755 = vmatprep.subr.bf16.mxu0 %v1754_v15  ;;  %1932 = vmatpush1.bf16.msra.mxu1 %v1780_v39  ;;  %v1774_v48 = vpack.c.bf16 %v115_v47, %v114_v46  ;;  %v2276_v61 = vpack.c.bf16 %v438_v60, %v436_v59  ;;  %v435_v62 = vld [vmem:[%s2840_s5] sm:$0xff]  ;;  %v437_v63 = vld [vmem:[%s2840_s5 + $0x10] sm:$0xff]  ;;  %v440_v0 = vld [vmem:[%s2840_s5 + $0x28] sm:$0xff] }
  0x1f   :  { %1931 = vmatprep.subr.bf16.mxu1 %v1782_v41  ;;  %v442_v1 = vld [vmem:[%s2840_s5 + $0x38] sm:$0xff]  ;;  %v2292_v4 = vpack.c.bf16 %v437_v63, %v435_v62  ;;  %v439_v6 = vld [vmem:[%s2840_s5 + $0x20] sm:$0xff]  ;;  %v441_v7 = vld [vmem:[%s2840_s5 + $0x30] sm:$0xff] }
  0x20   :  { %74 = vperm.xlu1 %1951, %v49_v18   ;;  %71 = vperm.xlu0 %1950, %v48_v19   ;;  %v2295_v5 = vpack.c.bf16 %v442_v1, %v440_v0  ;;  %v444_v8 = vld [vmem:[%s2840_s5 + $0x48] sm:$0xff]  ;;  %v446_v9 = vld [vmem:[%s2840_s5 + $0x58] sm:$0xff]  ;;  %v2312_v12 = vpack.c.bf16 %v441_v7, %v439_v6  ;;  %v445_v16 = vld [vmem:[%s2840_s5 + $0x50] sm:$0xff] }
  0x21   :  { %1757 = vmatpush3.bf16.msra.mxu0 %v1754_v15  ;;  %v2315_v13 = vpack.c.bf16 %v446_v9, %v444_v8  ;;  %v443_v15 = vld [vmem:[%s2840_s5 + $0x40] sm:$0xff]  ;;  %v448_v19 = vld [vmem:[%s2840_s5 + $0x68] sm:$0xff] }
  0x22   :  { %1759 = vmatprep.subr.bf16.mxu0 %v1758_v21  ;;  %1933 = vmatpush1.bf16.msra.mxu1 %v1784_v45  ;;  %v2330_v18 = vpack.c.bf16 %v445_v16, %v443_v15  ;;  %v447_v23 = vld [vmem:[%s2840_s5 + $0x60] sm:$0xff] }
  0x23   :  { %1787 = vmatprep.subr.bf16.mxu1 %v2276_v61  ;;  %v229_v31 = vld [vmem:[#allocation2] sm:$0x3] }
  0x24   :  { %418 = vperm.xlu1 %1951, %v414_v24   ;;  %v449_v24 = vld [vmem:[%s2840_s5 + $0x70] sm:$0xff]  ;;  %v234_v35 = vrot.slane %v229_v31, %v233_v30  ;;  %v1345_v60 = vld [vmem:[%s2841_s6] sm:$0xff] }
  0x25   :  { %1761 = vmatpush3.bf16.msra.mxu0 %v1758_v21  ;;  %v450_v21 = vld [vmem:[%s2840_s5 + $0x78] sm:$0xff]  ;;  %v2353_v28 = vpack.c.bf16 %v449_v24, %v447_v23  ;;  %s2085_s5 = smov 64  }
  0x26   :  { %1763 = vmatprep.subr.bf16.mxu0 %v1762_v26  ;;  %v2349_v27 = vpack.c.bf16 %v450_v21, %v448_v19 }
  0x29   :  { %1765 = vmatpush3.bf16.msra.mxu0 %v1762_v26 }
  0x2a   :  { %1767 = vmatprep.subr.bf16.mxu0 %v1766_v37 }
  0x2d   :  { %1769 = vmatpush3.bf16.msra.mxu0 %v1766_v37  ;;  %v238_v37 = vrot.slane %v229_v31, %v237_v33 }
  0x2e   :  { %1771 = vmatprep.subr.bf16.mxu0 %v1770_v44 }
  0x31   :  { %1773 = vmatpush3.bf16.msra.mxu0 %v1770_v44 }
  0x32   :  { %1775 = vmatprep.subr.bf16.mxu0 %v1774_v48 }
  0x35   :  { %1777 = vmatpush3.bf16.msra.mxu0 %v1774_v48 }
  0x36   :  { %1779 = vmatprep.subr.bf16.mxu0 %v1778_v32 }
  0x93   :  { %v60_v49 = vpop.permute.xlu1 %59  ;;  %v54_v50 = vpop.permute.xlu0 %53 }
  0x94   :  { %vm76_vm1 = vcmp.eq.s32.totalorder %v2211_v25, %v54_v50  ;;  %vm78_vm2 = vcmp.eq.s32.totalorder %v2211_v25, %v60_v49 }
  0x95   :  { %1706 = vmatprep.mubr.msk.f32.mxu0 %vm76_vm1, %v2082_v51 }
  0x97   :  { %v63_v52 = vpop.permute.xlu1 %62  ;;  %v57_v53 = vpop.permute.xlu0 %56 }
  0x98   :  { %vm77_vm3 = vcmp.eq.s32.totalorder %v2211_v25, %v57_v53  ;;  %vm79_vm4 = vcmp.eq.s32.totalorder %v2211_v25, %v63_v52 }
  0x99   :  { %1707 = vmatmul.mubr.msk.f32.vlgmr.msra.gmra.mrb[0].mxu0 %vm77_vm3, %v2082_v51 }
  0x9a   :  { %1709 = vmatprep.mubr.msk.f32.mxu0 %vm78_vm2, %v2082_v51  ;;  %1781 = vmatpush1.bf16.msra.mxu0 %v1780_v39 }
  0x9b   :  { %v69_v54 = vpop.permute.xlu1 %68  ;;  %v66_v55 = vpop.permute.xlu0 %65  ;;  %1783 = vmatprep.subr.bf16.mxu0 %v1782_v41  ;;  %v2382_v41 = vadd.s32 128, %v2211_v25 }
  0x9c   :  { %vm80_vm5 = vcmp.eq.s32.totalorder %v2211_v25, %v66_v55  ;;  %vm81_vm6 = vcmp.eq.s32.totalorder %v2211_v25, %v69_v54 }
  0x9d   :  { %1710 = vmatmul.mubr.msk.f32.gmra.mrb[2].mxu0 %vm79_vm4, %v2082_v51  ;;  %v397_v49 = vand.u32 63, %v2382_v41  ;;  %vm383_vm12 = vcmp.lt.s32.totalorder %v2382_v41, 192  ;;  %v1348_v41 = vld [vmem:[%s2841_s6 + $0x18] sm:$0xff] }
  0x9e   :  { %1712 = vmatprep.mubr.msk.f32.mxu0 %vm80_vm5, %v2082_v51  ;;  %1785 = vmatpush1.bf16.msra.mxu0 %v1784_v45 }
  0x9f   :  { %v72_v56 = vpop.permute.xlu0 %71  ;;  %v75_v57 = vpop.permute.xlu1 %74  ;;  %1803 = vmatprep.subr.bf16.mxu0 %v2276_v61  ;;  %vm2404_vm11 = vcmp.lt.s32.totalorder %v397_v49, 32 }
  0xa0   :  { %vm82_vm7 = vcmp.eq.s32.totalorder %v2211_v25, %v72_v56  ;;  %vm83_vm8 = vcmp.eq.s32.totalorder %v2211_v25, %v75_v57 }
  0xa1   :  { %1713 = vmatmul.mubr.msk.f32.gmra.mrb[4].mxu0 %vm81_vm6, %v2082_v51 }
  0xa2   :  { %1715 = vmatprep.mubr.msk.f32.mxu0 %vm82_vm7, %v2082_v51 }
  0xa5   :  { %1716 = vmatmul.mubr.msk.f32.gmra.mrb[6].mxu0 %vm83_vm8, %v2082_v51 }
  0xa6   :  { %330 = vmatprep.mubr.f32.mxu0 %v2083_v58 }
 0x16c   :  { %v1708_v2 = vpop.f32.mrb[0].mxu0 }
 0x16d   :  { %v182_v3 = vpop.f32.mrb[1].mxu0 }
 0x16e   :  { %1610 = vmatmul.mubr.msk.f32.vlgmr.msra.gmra.mrb[8].mxu0 %vm241_vm9, %v182_v3 }
 0x16f   :  { %336 = vmatprep.mubr.f32.mxu0 %v2083_v58  ;;  %1805 = vmatpush1.bf16.msra.mxu0 %v2292_v4 }
 0x170   :  { %v1711_v10 = vpop.f32.mrb[2].mxu0  ;;  %1807 = vmatprep.subr.bf16.mxu0 %v2295_v5 }
 0x171   :  { %v192_v11 = vpop.f32.mrb[3].mxu0 }
 0x172   :  { %1611 = vmatmul.mubr.msk.f32.gmra.mrb[10].mxu0 %vm241_vm9, %v1708_v2 }
 0x173   :  { %342 = vmatprep.mubr.f32.mxu0 %v2083_v58  ;;  %1809 = vmatpush1.bf16.msra.mxu0 %v2312_v12 }
 0x174   :  { %v1714_v14 = vpop.f32.mrb[4].mxu0  ;;  %1811 = vmatprep.subr.bf16.mxu0 %v2315_v13 }
 0x175   :  { %v202_v17 = vpop.f32.mrb[5].mxu0 }
 0x176   :  { %1612 = vmatmul.mubr.msk.f32.gmra.mrb[12].mxu0 %vm241_vm9, %v192_v11  ;;  %1614 = vmatmul.mubr.msk.f32.vlgmr.msra.gmra.mrb[0].mxu1 %vm241_vm9, %v202_v17 }
 0x177   :  { %1789 = vmatpush1.bf16.msra.mxu1 %v2292_v4  ;;  %348 = vmatprep.mubr.f32.mxu0 %v2083_v58 }
 0x178   :  { %v1717_v22 = vpop.f32.mrb[6].mxu0  ;;  %360 = vmatprep.mubr.f32.mxu1 %v2083_v58  ;;  %1791 = vmatprep.subr.bf16.mxu1 %v2295_v5 }
 0x179   :  { %v212_v26 = vpop.f32.mrb[7].mxu0  ;;  %1813 = vmatpush1.bf16.msra.mxu0 %v2330_v18 }
 0x17a   :  { %1613 = vmatmul.mubr.msk.f32.gmra.mrb[14].mxu0 %vm241_vm9, %v1711_v10  ;;  %1615 = vmatmul.mubr.msk.f32.gmra.mrb[2].mxu1 %vm241_vm9, %v1714_v14 }
 0x17b   :  { %1793 = vmatpush1.bf16.msra.mxu1 %v2312_v12  ;;  %366 = vmatprep.mubr.f32.mxu1 %v2083_v58 }
 0x17c   :  { %1795 = vmatprep.subr.bf16.mxu1 %v2315_v13  ;;  %1815 = vmatprep.subr.bf16.mxu0 %v2349_v27 }
 0x17d   :  { %1817 = vmatpush1.bf16.msra.mxu0 %v2353_v28  ;;  %628 = vmatprep.mubr.f32.mxu0 %v2083_v58 }
 0x17e   :  { %1616 = vmatmul.mubr.msk.f32.gmra.mrb[4].mxu1 %vm241_vm9, %v212_v26  ;;  %1835 = vmatprep.subr.bf16.mxu0 %v2276_v61 }
 0x17f   :  { %1797 = vmatpush1.bf16.msra.mxu1 %v2330_v18  ;;  %372 = vmatprep.mubr.f32.mxu1 %v2083_v58 }
 0x180   :  { %1799 = vmatprep.subr.bf16.mxu1 %v2349_v27 }
 0x182   :  { %1617 = vmatmul.mubr.msk.f32.gmra.mrb[6].mxu1 %vm241_vm9, %v1717_v22 }
 0x183   :  { %1801 = vmatpush1.bf16.msra.mxu1 %v2353_v28  ;;  %521 = vmatprep.mubr.f32.mxu1 %v2083_v58 }
 0x184   :  { %1819 = vmatprep.subr.bf16.mxu1 %v2276_v61 }
 0x186   :  { %522 = vmatmul.mubr.f32.vlgmr.msra.gmra.mrb[8].mxu1 %v2083_v58 }
 0x187   :  { %1821 = vmatpush1.bf16.msra.mxu1 %v2292_v4  ;;  %740 = vmatprep.mubr.f32.mxu1 %v2083_v58 }
 0x188   :  { %1823 = vmatprep.subr.bf16.mxu1 %v2295_v5 }
 0x18b   :  { %1825 = vmatpush1.bf16.msra.mxu1 %v2312_v12 }
 0x18c   :  { %1827 = vmatprep.subr.bf16.mxu1 %v2315_v13 }
 0x18f   :  { %1829 = vmatpush1.bf16.msra.mxu1 %v2330_v18 }
 0x190   :  { %1831 = vmatprep.subr.bf16.mxu1 %v2349_v27 }
 0x193   :  { %1833 = vmatpush1.bf16.msra.mxu1 %v2353_v28 }
 0x194   :  { %1851 = vmatprep.subr.bf16.mxu1 %v2276_v61 }
 0x241   :  { %v332_v32 = vpop.f32.mrb[8].mxu0 }
 0x242   :  { %v334_v34 = vpop.f32.mrb[9].mxu0  ;;  %v2464_v23 = vadd.f32 %v332_v32, %v234_v35 }
 0x243   :  { %v2468_v29 = vadd.f32 %v334_v34, %v238_v37 }
 0x245   :  { %v338_v38 = vpop.f32.mrb[10].mxu0 }
 0x246   :  { %v2379_v39 = vadd.f32 %v338_v38, %v234_v35  ;;  %v340_v40 = vpop.f32.mrb[11].mxu0  ;;  %v2084_v38 = vmov 0.5  }
 0x247   :  { %v2384_v42 = vadd.f32 %v340_v40, %v238_v37  ;;  %v2491_v40 = vsel %vm383_vm12, 1.0, %v2084_v38  ;;  %v2086_v38 = vmov 7  }
 0x249   :  { %v344_v43 = vpop.f32.mrb[12].mxu0  ;;  %v356_v44 = vpop.f32.mrb[0].mxu1 }
 0x24a   :  { %v2387_v45 = vadd.f32 %v344_v43, %v234_v35  ;;  %v2389_v46 = vadd.f32 %v356_v44, %v234_v35  ;;  %v346_v47 = vpop.f32.mrb[13].mxu0  ;;  %v358_v48 = vpop.f32.mrb[1].mxu1 }
 0x24b   :  { %v2392_v50 = vadd.f32 %v346_v47, %v238_v37  ;;  %v2394_v51 = vadd.f32 %v358_v48, %v238_v37 }
 0x24d   :  { %v350_v52 = vpop.f32.mrb[14].mxu0  ;;  %v362_v53 = vpop.f32.mrb[2].mxu1 }
 0x24e   :  { %v2400_v55 = vadd.f32 %v350_v52, %v234_v35  ;;  %v2402_v56 = vadd.f32 %v362_v53, %v234_v35  ;;  %v352_v57 = vpop.f32.mrb[15].mxu0  ;;  %v364_v59 = vpop.f32.mrb[3].mxu1 }
 0x24f   :  { %v2408_v62 = vadd.f32 %v352_v57, %v238_v37  ;;  %v2410_v63 = vadd.f32 %v364_v59, %v238_v37 }
 0x250   :  { %v671_v0 = vsel %vm2396_vm10, %v2387_v45, %v2402_v56  ;;  %v783_v1 = vsel %vm2396_vm10, %v2400_v55, %v2389_v46  ;;  %v895_v2 = vsel %vm2396_vm10, %v2389_v46, %v2400_v55  ;;  %v1007_v3 = vsel %vm2396_vm10, %v2402_v56, %v2387_v45 }
 0x251   :  { %v368_v6 = vpop.f32.mrb[4].mxu1  ;;  %v672_v7 = vsel %vm2404_vm11, %v2392_v50, %v2410_v63  ;;  %v784_v8 = vsel %vm2404_vm11, %v2408_v62, %v2394_v51  ;;  %v896_v9 = vsel %vm2404_vm11, %v2394_v51, %v2408_v62  ;;  %v1008_v10 = vsel %vm2404_vm11, %v2410_v63, %v2392_v50 }
 0x252   :  { %v2444_v11 = vadd.f32 %v368_v6, %v234_v35  ;;  %v370_v14 = vpop.f32.mrb[5].mxu1 }
 0x253   :  { %v2446_v15 = vadd.f32 %v370_v14, %v238_v37 }
 0x254   :  { %v559_v16 = vsel %vm2396_vm10, %v2379_v39, %v2444_v11  ;;  %v1119_v17 = vsel %vm2396_vm10, %v2444_v11, %v2379_v39 }
 0x255   :  { %v374_v19 = vpop.f32.mrb[6].mxu1  ;;  %v560_v21 = vsel %vm2404_vm11, %v2384_v42, %v2446_v15  ;;  %v1120_v22 = vsel %vm2404_vm11, %v2446_v15, %v2384_v42 }
 0x256   :  { %v2466_v24 = vadd.f32 %v374_v19, %v234_v35  ;;  %v376_v26 = vpop.f32.mrb[7].mxu1 }
 0x257   :  { %v2470_v30 = vadd.f32 %v376_v26, %v238_v37 }
 0x258   :  { %v451_v31 = vsel %vm2396_vm10, %v2464_v23, %v2466_v24  ;;  %v1231_v32 = vsel %vm2396_vm10, %v2466_v24, %v2464_v23 }
 0x259   :  { %v523_v33 = vpop.f32.mrb[8].mxu1  ;;  %v452_v34 = vsel %vm2404_vm11, %v2468_v29, %v2470_v30  ;;  %v1232_v35 = vsel %vm2404_vm11, %v2470_v30, %v2468_v29  ;;  %v1346_v29 = vld [vmem:[%s2841_s6 + $0x8] sm:$0xff]  ;;  %v1347_v30 = vld [vmem:[%s2841_s6 + $0x10] sm:$0xff] }
 0x25a   :  { %v528_v37 = vadd.f32 %v523_v33, %v451_v31  ;;  %v525_v43 = vpop.f32.mrb[9].mxu1 }
 0x25b   :  { %v529_v44 = vadd.f32 %v525_v43, %v452_v34  ;;  %v416_v43 = vsel %vm415_vm0, 0, %v2086_v38 }
 0x25c   :  { %v530_v20 = vmul.f32 0.5, %v528_v37  ;;  %v2499_v37 = vpop.permute.xlu1 %418 }
 0x25d   :  { %v531_v47 = vmul.f32 %v529_v44, %v2491_v40  ;;  %vm420_vm13 = vcmp.gt.s32.totalorder %v2499_v37, %v416_v43 }
 0x25e   :  { %1952 = vtanh.f32 %v530_v20 }
 0x25f   :  { %1954 = vtanh.f32 %v531_v47 }
 0x268   :  { %v1953_v48 = vpop.eup %1952 }
 0x269   :  { %v1955_v49 = vpop.eup %1954  ;;  %v534_v52 = vadd.f32 1.0, %v1953_v48 }
 0x26a   :  { %v535_v53 = vadd.f32 1.0, %v1955_v49 }
 0x26b   :  { %v536_v59 = vmul.f32 0.5, %v534_v52 }
 0x26c   :  { %v537_v57 = vmul.f32 0.5, %v535_v53 }
 0x26d   :  { %v540_v19 = vmul.f32 0.0, %v536_v59 }
 0x26e   :  { %v539_v6 = vsel %vm383_vm12, %v1955_v49, %v537_v57 }
 0x26f   :  { %v541_v14 = vmul.f32 %v539_v6, %v536_v59 }
 0x271   :  { %543 = vrot.lane.b32.xlu0 %v541_v14, %s2085_s5 }
 0x2e3   :  { %v544_v26 = vpop.permute.xlu0 %543 }
 0x2e4   :  { %v546_v31 = vadd.f32 %v544_v26, %v540_v19 }
 0x2e6   :  { %1956 = vtanh.f32 %v546_v31  ;;  %555 = vrot.lane.b32.xlu1 %v546_v31, %s2085_s5 }
 0x2f0   :  { %v1957_v33 = vpop.eup %1956 }
 0x2f1   :  { %v548_v34 = vmul.f32 %v1957_v33, %v539_v6 }
 0x2f3   :  { %550 = vrot.lane.b32.xlu0 %v548_v34, %s2085_s5 }
 0x358   :  { %v556_v44 = vpop.permute.xlu1 %555 }
 0x359   :  { %v558_v20 = vsel %vm420_vm13, %v556_v44, 0.0 }
 0x35a   :  { %648 = vrot.lane.b32.xlu0 %v558_v20, %s2085_s5 }
 0x365   :  { %v551_v47 = vpop.permute.xlu0 %550 }
 0x366   :  { %v2505_v48 = vsel %vm420_vm13, %v551_v47, 0.0 }
 0x367   :  { %1618 = vmatmul.mubr.msk.f32.vlgmr.msra.gmra.mrb[16].mxu0 %vm453_vm14, %v2505_v48 }
 0x368   :  { %1837 = vmatpush1.bf16.msra.mxu0 %v2292_v4  ;;  %852 = vmatprep.mubr.f32.mxu0 %v2083_v58 }
 0x369   :  { %1839 = vmatprep.subr.bf16.mxu0 %v2295_v5 }
 0x36c   :  { %1841 = vmatpush1.bf16.msra.mxu0 %v2312_v12 }
 0x36d   :  { %1843 = vmatprep.subr.bf16.mxu0 %v2315_v13 }
 0x370   :  { %1845 = vmatpush1.bf16.msra.mxu0 %v2330_v18 }
 0x371   :  { %1847 = vmatprep.subr.bf16.mxu0 %v2349_v27 }
 0x374   :  { %1849 = vmatpush1.bf16.msra.mxu0 %v2353_v28 }
 0x375   :  { %1867 = vmatprep.subr.bf16.mxu0 %v2276_v61 }
 0x3cc   :  { %v649_v43 = vpop.permute.xlu0 %648 }
 0x43a   :  { %v630_v49 = vpop.f32.mrb[16].mxu0 }
 0x43b   :  { %v635_v52 = vadd.f32 %v630_v49, %v559_v16  ;;  %v632_v53 = vpop.f32.mrb[17].mxu0 }
 0x43c   :  { %v636_v57 = vadd.f32 %v632_v53, %v560_v21  ;;  %v2087_v53 = vmov 6  }
 0x43d   :  { %v637_v59 = vmul.f32 0.5, %v635_v52 }
 0x43e   :  { %v638_v6 = vmul.f32 %v636_v57, %v2491_v40  ;;  %v2536_v57 = vsel %vm415_vm0, 1, %v2087_v53 }
 0x43f   :  { %1958 = vtanh.f32 %v637_v59  ;;  %vm422_vm15 = vcmp.gt.s32.totalorder %v2499_v37, %v2536_v57 }
 0x440   :  { %1960 = vtanh.f32 %v638_v6 }
 0x449   :  { %v1959_v14 = vpop.eup %1958 }
 0x44a   :  { %v1961_v19 = vpop.eup %1960  ;;  %v641_v26 = vadd.f32 1.0, %v1959_v14 }
 0x44b   :  { %v642_v31 = vadd.f32 1.0, %v1961_v19 }
 0x44c   :  { %v643_v34 = vmul.f32 0.5, %v641_v26 }
 0x44d   :  { %v644_v33 = vmul.f32 0.5, %v642_v31 }
 0x44e   :  { %v651_v44 = vmul.f32 %v649_v43, %v643_v34 }
 0x44f   :  { %v646_v16 = vsel %vm383_vm12, %v1961_v19, %v644_v33 }
 0x450   :  { %v652_v38 = vmul.f32 %v646_v16, %v643_v34 }
 0x452   :  { %654 = vrot.lane.b32.xlu1 %v652_v38, %s2085_s5 }
 0x4c4   :  { %v655_v21 = vpop.permute.xlu1 %654 }
 0x4c5   :  { %v657_v47 = vadd.f32 %v655_v21, %v651_v44 }
 0x4c7   :  { %1962 = vtanh.f32 %v657_v47  ;;  %667 = vrot.lane.b32.xlu1 %v657_v47, %s2085_s5 }
 0x4d1   :  { %v1963_v49 = vpop.eup %1962 }
 0x4d2   :  { %v659_v52 = vmul.f32 %v1963_v49, %v646_v16 }
 0x4d4   :  { %661 = vrot.lane.b32.xlu0 %v659_v52, %s2085_s5 }
 0x539   :  { %v668_v59 = vpop.permute.xlu1 %667 }
 0x53a   :  { %v670_v6 = vsel %vm422_vm15, %v668_v59, %v558_v20 }
 0x53b   :  { %760 = vrot.lane.b32.xlu0 %v670_v6, %s2085_s5 }
 0x546   :  { %v2544_v14 = vpop.permute.xlu0 %661 }
 0x547   :  { %v665_v19 = vsel %vm422_vm15, %v2544_v14, %v2505_v48 }
 0x548   :  { %1619 = vmatmul.mubr.msk.f32.vlgmr.msra.gmra.mrb[10].mxu1 %vm453_vm14, %v665_v19 }
 0x549   :  { %1853 = vmatpush1.bf16.msra.mxu1 %v2292_v4  ;;  %964 = vmatprep.mubr.f32.mxu1 %v2083_v58 }
 0x54a   :  { %1855 = vmatprep.subr.bf16.mxu1 %v2295_v5 }
 0x54d   :  { %1857 = vmatpush1.bf16.msra.mxu1 %v2312_v12 }
 0x54e   :  { %1859 = vmatprep.subr.bf16.mxu1 %v2315_v13 }
 0x551   :  { %1861 = vmatpush1.bf16.msra.mxu1 %v2330_v18 }
 0x552   :  { %1863 = vmatprep.subr.bf16.mxu1 %v2349_v27 }
 0x555   :  { %1865 = vmatpush1.bf16.msra.mxu1 %v2353_v28 }
 0x556   :  { %1883 = vmatprep.subr.bf16.mxu1 %v2276_v61 }
 0x5ad   :  { %v761_v53 = vpop.permute.xlu0 %760 }
 0x61b   :  { %v742_v20 = vpop.f32.mrb[10].mxu1 }
 0x61c   :  { %v747_v26 = vadd.f32 %v742_v20, %v671_v0  ;;  %v744_v31 = vpop.f32.mrb[11].mxu1 }
 0x61d   :  { %v748_v33 = vadd.f32 %v744_v31, %v672_v7 }
 0x61e   :  { %v749_v34 = vmul.f32 0.5, %v747_v26 }
 0x61f   :  { %v750_v16 = vmul.f32 %v748_v33, %v2491_v40  ;;  %v2088_v33 = vmov 5  }
 0x620   :  { %1964 = vtanh.f32 %v749_v34  ;;  %v2579_v34 = vsel %vm415_vm0, 2, %v2088_v33 }
 0x621   :  { %1966 = vtanh.f32 %v750_v16  ;;  %vm424_vm1 = vcmp.gt.s32.totalorder %v2499_v37, %v2579_v34 }
 0x62a   :  { %v1965_v38 = vpop.eup %1964 }
 0x62b   :  { %v1967_v43 = vpop.eup %1966  ;;  %v753_v44 = vadd.f32 1.0, %v1965_v38 }
 0x62c   :  { %v754_v21 = vadd.f32 1.0, %v1967_v43 }
 0x62d   :  { %v755_v49 = vmul.f32 0.5, %v753_v44 }
 0x62e   :  { %v756_v47 = vmul.f32 0.5, %v754_v21 }
 0x62f   :  { %v763_v59 = vmul.f32 %v761_v53, %v755_v49 }
 0x630   :  { %v758_v0 = vsel %vm383_vm12, %v1967_v43, %v756_v47 }
 0x631   :  { %v764_v52 = vmul.f32 %v758_v0, %v755_v49 }
 0x633   :  { %766 = vrot.lane.b32.xlu1 %v764_v52, %s2085_s5 }
 0x6a5   :  { %v767_v7 = vpop.permute.xlu1 %766 }
 0x6a6   :  { %v769_v20 = vadd.f32 %v767_v7, %v763_v59 }
 0x6a8   :  { %1968 = vtanh.f32 %v769_v20  ;;  %779 = vrot.lane.b32.xlu1 %v769_v20, %s2085_s5 }
 0x6b2   :  { %v1969_v26 = vpop.eup %1968 }
 0x6b3   :  { %v771_v31 = vmul.f32 %v1969_v26, %v758_v0 }
 0x6b5   :  { %773 = vrot.lane.b32.xlu0 %v771_v31, %s2085_s5 }
 0x71a   :  { %v780_v16 = vpop.permute.xlu1 %779 }
 0x71b   :  { %v782_v38 = vsel %vm424_vm1, %v780_v16, %v670_v6 }
 0x71c   :  { %872 = vrot.lane.b32.xlu0 %v782_v38, %s2085_s5 }
 0x727   :  { %v2587_v43 = vpop.permute.xlu0 %773 }
 0x728   :  { %v777_v44 = vsel %vm424_vm1, %v2587_v43, %v665_v19 }
 0x729   :  { %1620 = vmatmul.mubr.msk.f32.vlgmr.msra.gmra.mrb[18].mxu0 %vm453_vm14, %v777_v44 }
 0x72a   :  { %1869 = vmatpush1.bf16.msra.mxu0 %v2292_v4  ;;  %1076 = vmatprep.mubr.f32.mxu0 %v2083_v58 }
 0x72b   :  { %1871 = vmatprep.subr.bf16.mxu0 %v2295_v5 }
 0x72e   :  { %1873 = vmatpush1.bf16.msra.mxu0 %v2312_v12 }
 0x72f   :  { %1875 = vmatprep.subr.bf16.mxu0 %v2315_v13 }
 0x732   :  { %1877 = vmatpush1.bf16.msra.mxu0 %v2330_v18 }
 0x733   :  { %1879 = vmatprep.subr.bf16.mxu0 %v2349_v27 }
 0x736   :  { %1881 = vmatpush1.bf16.msra.mxu0 %v2353_v28 }
 0x737   :  { %1899 = vmatprep.subr.bf16.mxu0 %v2276_v61 }
 0x78e   :  { %v873_v31 = vpop.permute.xlu0 %872 }
 0x7fc   :  { %v854_v6 = vpop.f32.mrb[18].mxu0 }
 0x7fd   :  { %v859_v19 = vadd.f32 %v854_v6, %v783_v1  ;;  %v856_v21 = vpop.f32.mrb[19].mxu0 }
 0x7fe   :  { %v860_v47 = vadd.f32 %v856_v21, %v784_v8  ;;  %v2089_v21 = vmov 4  }
 0x7ff   :  { %v861_v49 = vmul.f32 0.5, %v859_v19 }
 0x800   :  { %v862_v0 = vmul.f32 %v860_v47, %v2491_v40  ;;  %v425_v47 = vsel %vm415_vm0, 3, %v2089_v21  ;;  %v2090_v21 = vmov 3  }
 0x801   :  { %1970 = vtanh.f32 %v861_v49  ;;  %vm426_vm2 = vcmp.gt.s32.totalorder %v2499_v37, %v425_v47 }
 0x802   :  { %1972 = vtanh.f32 %v862_v0 }
 0x80b   :  { %v1971_v61 = vpop.eup %1970 }
 0x80c   :  { %v1973_v52 = vpop.eup %1972  ;;  %v865_v53 = vadd.f32 1.0, %v1971_v61 }
 0x80d   :  { %v866_v59 = vadd.f32 1.0, %v1973_v52 }
 0x80e   :  { %v867_v20 = vmul.f32 0.5, %v865_v53 }
 0x80f   :  { %v868_v7 = vmul.f32 0.5, %v866_v59 }
 0x810   :  { %v875_v33 = vmul.f32 %v873_v31, %v867_v20 }
 0x811   :  { %v870_v1 = vsel %vm383_vm12, %v1973_v52, %v868_v7 }
 0x812   :  { %v876_v26 = vmul.f32 %v870_v1, %v867_v20 }
 0x814   :  { %878 = vrot.lane.b32.xlu1 %v876_v26, %s2085_s5 }
 0x886   :  { %v879_v8 = vpop.permute.xlu1 %878 }
 0x887   :  { %v881_v16 = vadd.f32 %v879_v8, %v875_v33 }
 0x889   :  { %1974 = vtanh.f32 %v881_v16  ;;  %891 = vrot.lane.b32.xlu1 %v881_v16, %s2085_s5 }
 0x893   :  { %v1975_v6 = vpop.eup %1974 }
 0x894   :  { %v883_v19 = vmul.f32 %v1975_v6, %v870_v1 }
 0x896   :  { %885 = vrot.lane.b32.xlu0 %v883_v19, %s2085_s5 }
 0x8fb   :  { %v892_v49 = vpop.permute.xlu1 %891 }
 0x8fc   :  { %v894_v0 = vsel %vm426_vm2, %v892_v49, %v782_v38  ;;  %v427_v49 = vsel %vm415_vm0, 4, %v2090_v21 }
 0x8fd   :  { %984 = vrot.lane.b32.xlu0 %v894_v0, %s2085_s5  ;;  %vm428_vm3 = vcmp.gt.s32.totalorder %v2499_v37, %v427_v49 }
 0x908   :  { %v886_v61 = vpop.permute.xlu0 %885 }
 0x909   :  { %v889_v52 = vsel %vm426_vm2, %v886_v61, %v777_v44 }
 0x90a   :  { %1621 = vmatmul.mubr.msk.f32.vlgmr.msra.gmra.mrb[12].mxu1 %vm453_vm14, %v889_v52 }
 0x90b   :  { %1885 = vmatpush1.bf16.msra.mxu1 %v2292_v4  ;;  %1188 = vmatprep.mubr.f32.mxu1 %v2083_v58 }
 0x90c   :  { %1887 = vmatprep.subr.bf16.mxu1 %v2295_v5 }
 0x90f   :  { %1889 = vmatpush1.bf16.msra.mxu1 %v2312_v12 }
 0x910   :  { %1891 = vmatprep.subr.bf16.mxu1 %v2315_v13 }
 0x913   :  { %1893 = vmatpush1.bf16.msra.mxu1 %v2330_v18 }
 0x914   :  { %1895 = vmatprep.subr.bf16.mxu1 %v2349_v27 }
 0x917   :  { %1897 = vmatpush1.bf16.msra.mxu1 %v2353_v28 }
 0x9dd   :  { %v966_v38 = vpop.f32.mrb[12].mxu1 }
 0x9de   :  { %v971_v44 = vadd.f32 %v966_v38, %v895_v2  ;;  %v968_v53 = vpop.f32.mrb[13].mxu1  ;;  %v985_v2 = vpop.permute.xlu0 %984 }
 0x9df   :  { %v972_v59 = vadd.f32 %v968_v53, %v896_v9 }
 0x9e0   :  { %v973_v7 = vmul.f32 0.5, %v971_v44 }
 0x9e1   :  { %v974_v20 = vmul.f32 %v972_v59, %v2491_v40  ;;  %v888_v59 = vsel %vm426_vm2, %v886_v61, 0.0 }
 0x9e2   :  { %1976 = vtanh.f32 %v973_v7 }
 0x9e3   :  { %1978 = vtanh.f32 %v974_v20 }
 0x9ec   :  { %v1977_v1 = vpop.eup %1976 }
 0x9ed   :  { %v1979_v26 = vpop.eup %1978  ;;  %v977_v31 = vadd.f32 1.0, %v1977_v1 }
 0x9ee   :  { %v978_v33 = vadd.f32 1.0, %v1979_v26 }
 0x9ef   :  { %v979_v16 = vmul.f32 0.5, %v977_v31 }
 0x9f0   :  { %v980_v8 = vmul.f32 0.5, %v978_v33 }
 0x9f1   :  { %v987_v51 = vmul.f32 %v985_v2, %v979_v16 }
 0x9f2   :  { %v982_v46 = vsel %vm383_vm12, %v1979_v26, %v980_v8  ;;  %v2091_v8 = vmov 2  }
 0x9f3   :  { %v988_v55 = vmul.f32 %v982_v46, %v979_v16  ;;  %v429_v16 = vsel %vm415_vm0, 5, %v2091_v8 }
 0x9f4   :  { %vm430_vm4 = vcmp.gt.s32.totalorder %v2499_v37, %v429_v16 }
 0x9f5   :  { %990 = vrot.lane.b32.xlu1 %v988_v55, %s2085_s5 }
 0xa67   :  { %v991_v62 = vpop.permute.xlu1 %990 }
 0xa68   :  { %v993_v9 = vadd.f32 %v991_v62, %v987_v51  ;;  %v776_v51 = vsel %vm424_vm1, %v2587_v43, 0.0 }
 0xa6a   :  { %1980 = vtanh.f32 %v993_v9  ;;  %1003 = vrot.lane.b32.xlu1 %v993_v9, %s2085_s5 }
 0xa74   :  { %v1981_v6 = vpop.eup %1980 }
 0xa75   :  { %v995_v19 = vmul.f32 %v1981_v6, %v982_v46 }
 0xa77   :  { %997 = vrot.lane.b32.xlu0 %v995_v19, %s2085_s5 }
 0xadc   :  { %v1004_v38 = vpop.permute.xlu1 %1003 }
 0xadd   :  { %v1006_v44 = vsel %vm428_vm3, %v1004_v38, %v894_v0 }
 0xade   :  { %1096 = vrot.lane.b32.xlu0 %v1006_v44, %s2085_s5 }
 0xae9   :  { %v998_v53 = vpop.permute.xlu0 %997 }
 0xaea   :  { %v1000_v7 = vsel %vm428_vm3, %v998_v53, 0.0  ;;  %v1001_v20 = vsel %vm428_vm3, %v998_v53, %v889_v52 }
 0xaeb   :  { %1622 = vmatmul.mubr.msk.f32.vlgmr.msra.gmra.mrb[20].mxu0 %vm453_vm14, %v1001_v20  ;;  %v2660_v1 = vsel %vm241_vm9, %v888_v59, %v1000_v7  ;;  %v2663_v26 = vsel %vm241_vm9, %v1000_v7, %v888_v59 }
 0xaec   :  { %1901 = vmatpush1.bf16.msra.mxu0 %v2292_v4  ;;  %1300 = vmatprep.mubr.f32.mxu0 %v2083_v58 }
 0xaed   :  { %1903 = vmatprep.subr.bf16.mxu0 %v2295_v5 }
 0xaf0   :  { %1905 = vmatpush1.bf16.msra.mxu0 %v2312_v12 }
 0xaf1   :  { %1907 = vmatprep.subr.bf16.mxu0 %v2315_v13 }
 0xaf4   :  { %1909 = vmatpush1.bf16.msra.mxu0 %v2330_v18 }
 0xaf5   :  { %1911 = vmatprep.subr.bf16.mxu0 %v2349_v27 }
 0xaf8   :  { %1913 = vmatpush1.bf16.msra.mxu0 %v2353_v28 }
 0xbbe   :  { %v1078_v47 = vpop.f32.mrb[20].mxu0 }
 0xbbf   :  { %v1083_v4 = vadd.f32 %v1078_v47, %v1007_v3  ;;  %v1080_v58 = vpop.f32.mrb[21].mxu0  ;;  %v1097_v3 = vpop.permute.xlu0 %1096 }
 0xbc0   :  { %v1084_v5 = vadd.f32 %v1080_v58, %v1008_v10 }
 0xbc1   :  { %v1085_v12 = vmul.f32 0.5, %v1083_v4 }
 0xbc2   :  { %v1086_v13 = vmul.f32 %v1084_v5, %v2491_v40 }
 0xbc3   :  { %1982 = vtanh.f32 %v1085_v12  ;;  %v2092_v12 = vmov 1  }
 0xbc4   :  { %1984 = vtanh.f32 %v1086_v13  ;;  %v431_v13 = vsel %vm415_vm0, 6, %v2092_v12  ;;  %vm434_vm0 = vcmp.gt.s32.totalorder %v2499_v37, %v2240_v36 }
 0xbc5   :  { %vm432_vm5 = vcmp.gt.s32.totalorder %v2499_v37, %v431_v13  ;;  %v1625_v37 = vld [vmem:[%s2842_s7] ss:$0 sm:$0xff]  ;;  %s2093_s7 = smov [#allocation5]  }
 0xbc6   :  { %s1582_s29 = sshll.u32 %s2093_s7, 4  ;;  %s1583_s29 = int_to_ptr.vmem [resolvable:$true] %s1582_s29 }
 0xbc7   :  { %s2054_s30 = scalar_lea.vmem %s1583_s29, 1024  ;;  %p2059_p9 = scmp.lt.s32.totalorder %s1583_s29, %s1583_s29 }
 0xbc8   :  { %p2055_p8 = scmp.ne.s32.totalorder %s1583_s29, %s2054_s30  ;;  %p2060_p10 = scmp.lt.s32.totalorder %s2054_s30, %s2054_s30 }
 0xbca   :  { %p2061_p11 = por %p2060_p10, %p2059_p9 }
 0xbcc   :  { %p2062_p12 = pnand %p2061_p11, %p2055_p8 }
 0xbcd   :  { %v1983_v18 = vpop.eup %1982 }
 0xbce   :  { %v1985_v27 = vpop.eup %1984  ;;  %v1089_v28 = vadd.f32 1.0, %v1983_v18 }
 0xbcf   :  { %v1090_v0 = vadd.f32 1.0, %v1985_v27 }
 0xbd0   :  { %v1091_v52 = vmul.f32 0.5, %v1089_v28 }
 0xbd1   :  { %v1092_v61 = vmul.f32 0.5, %v1090_v0  ;;  %v664_v0 = vsel %vm422_vm15, %v2544_v14, 0.0 }
 0xbd2   :  { %v1099_v50 = vmul.f32 %v1097_v3, %v1091_v52 }
 0xbd3   :  { %v1094_v45 = vsel %vm383_vm12, %v1985_v27, %v1092_v61 }
 0xbd4   :  { %v1100_v56 = vmul.f32 %v1094_v45, %v1091_v52 }
 0xbd6   :  { %1102 = vrot.lane.b32.xlu1 %v1100_v56, %s2085_s5 }
 0xc48   :  { %v1103_v63 = vpop.permute.xlu1 %1102 }
 0xc49   :  { %v1105_v10 = vadd.f32 %v1103_v63, %v1099_v50 }
 0xc4b   :  { %1986 = vtanh.f32 %v1105_v10  ;;  %1115 = vrot.lane.b32.xlu1 %v1105_v10, %s2085_s5 }
 0xc55   :  { %v1987_v31 = vpop.eup %1986 }
 0xc56   :  { %v1107_v33 = vmul.f32 %v1987_v31, %v1094_v45 }
 0xc58   :  { %1109 = vrot.lane.b32.xlu0 %v1107_v33, %s2085_s5 }
 0xcbd   :  { %v1116_v46 = vpop.permute.xlu1 %1115 }
 0xcbe   :  { %v1118_v55 = vsel %vm430_vm4, %v1116_v46, %v1006_v44  ;;  %v1350_v46 = vld [vmem:[%s2841_s6 + $0x28] sm:$0xff] }
 0xcbf   :  { %1208 = vrot.lane.b32.xlu0 %v1118_v55, %s2085_s5 }
 0xcca   :  { %v1110_v2 = vpop.permute.xlu0 %1109 }
 0xccb   :  { %v1112_v62 = vsel %vm430_vm4, %v1110_v2, 0.0  ;;  %v1113_v9 = vsel %vm430_vm4, %v1110_v2, %v1001_v20  ;;  %v1351_v2 = vld [vmem:[%s2841_s6 + $0x30] sm:$0xff] }
 0xccc   :  { %1623 = vmatmul.mubr.msk.f32.vlgmr.msra.gmra.mrb[14].mxu1 %vm453_vm14, %v1113_v9  ;;  %v2699_v6 = vsel %vm241_vm9, %v776_v51, %v1112_v62  ;;  %v2702_v19 = vsel %vm241_vm9, %v1112_v62, %v776_v51  ;;  %v1352_v51 = vld [vmem:[%s2841_s6 + $0x38] sm:$0xff] }
 0xccd   :  { %v1926_v62 = vpack.c.bf16 %v1352_v51, %v1351_v2 }
 0xd9f   :  { %v1190_v21 = vpop.f32.mrb[14].mxu1 }
 0xda0   :  { %v1195_v49 = vadd.f32 %v1190_v21, %v1119_v17  ;;  %v1192_v38 = vpop.f32.mrb[15].mxu1  ;;  %v1209_v17 = vpop.permute.xlu0 %1208 }
 0xda1   :  { %v1196_v34 = vadd.f32 %v1192_v38, %v1120_v22 }
 0xda2   :  { %v1197_v43 = vmul.f32 0.5, %v1195_v49 }
 0xda3   :  { %v1198_v44 = vmul.f32 %v1196_v34, %v2491_v40 }
 0xda4   :  { %1988 = vtanh.f32 %v1197_v43 }
 0xda5   :  { %1990 = vtanh.f32 %v1198_v44 }
 0xdae   :  { %v1989_v53 = vpop.eup %1988 }
 0xdaf   :  { %v1991_v59 = vpop.eup %1990  ;;  %v1201_v7 = vadd.f32 1.0, %v1989_v53 }
 0xdb0   :  { %v1202_v20 = vadd.f32 1.0, %v1991_v59 }
 0xdb1   :  { %v1203_v4 = vmul.f32 0.5, %v1201_v7 }
 0xdb2   :  { %v1204_v47 = vmul.f32 0.5, %v1202_v20 }
 0xdb3   :  { %v1211_v42 = vmul.f32 %v1209_v17, %v1203_v4 }
 0xdb4   :  { %v1206_v39 = vsel %vm383_vm12, %v1991_v59, %v1204_v47 }
 0xdb5   :  { %v1212_v11 = vmul.f32 %v1206_v39, %v1203_v4 }
 0xdb7   :  { %1214 = vrot.lane.b32.xlu1 %v1212_v11, %s2085_s5 }
 0xe29   :  { %v1215_v15 = vpop.permute.xlu1 %1214 }
 0xe2a   :  { %v1217_v22 = vadd.f32 %v1215_v15, %v1211_v42 }
 0xe2c   :  { %1992 = vtanh.f32 %v1217_v22  ;;  %1227 = vrot.lane.b32.xlu1 %v1217_v22, %s2085_s5 }
 0xe36   :  { %v1993_v58 = vpop.eup %1992 }
 0xe37   :  { %v1219_v5 = vmul.f32 %v1993_v58, %v1206_v39 }
 0xe39   :  { %1221 = vrot.lane.b32.xlu0 %v1219_v5, %s2085_s5 }
 0xe9e   :  { %v1228_v18 = vpop.permute.xlu1 %1227 }
 0xe9f   :  { %v1230_v27 = vsel %vm432_vm5, %v1228_v18, %v1118_v55 }
 0xea0   :  { %1320 = vrot.lane.b32.xlu0 %v1230_v27, %s2085_s5 }
 0xeab   :  { %v1222_v28 = vpop.permute.xlu0 %1221 }
 0xeac   :  { %v1224_v61 = vsel %vm432_vm5, %v1222_v28, 0.0  ;;  %v1225_v52 = vsel %vm432_vm5, %v1222_v28, %v1113_v9 }
 0xead   :  { %v1338_v45 = vsel %vm241_vm9, %v664_v0, %v1224_v61  ;;  %1624 = vmatmul.mubr.msk.f32.vlgmr.msra.gmra.mrb[22].mxu0 %vm453_vm14, %v1225_v52  ;;  %v1343_v25 = vsel %vm241_vm9, %v1224_v61, %v664_v0 }
 0xf12   :  { %v1321_v9 = vpop.permute.xlu0 %1320 }
 0xf80   :  { %v1302_v56 = vpop.f32.mrb[22].mxu0 }
 0xf81   :  { %v1307_v3 = vadd.f32 %v1302_v56, %v1231_v32  ;;  %v1304_v50 = vpop.f32.mrb[23].mxu0  ;;  %v1914_v32 = vpack.c.bf16 %v1346_v29, %v1345_v60 }
 0xf82   :  { %v1308_v57 = vadd.f32 %v1304_v50, %v1232_v35  ;;  %v1918_v35 = vpack.c.bf16 %v1348_v41, %v1347_v30 }
 0xf83   :  { %v1309_v14 = vmul.f32 0.5, %v1307_v3  ;;  %1915 = vmatprep.subr.bf16.mxu1 %v1914_v32 }
 0xf84   :  { %v1310_v63 = vmul.f32 %v1308_v57, %v2491_v40  ;;  %v1349_v40 = vld [vmem:[%s2841_s6 + $0x20] sm:$0xff]  ;;  %1917 = vmatpush3.bf16.msra.mxu1 %v1914_v32 }
 0xf85   :  { %1994 = vtanh.f32 %v1309_v14  ;;  %1919 = vmatprep.subr.bf16.mxu1 %v1918_v35  ;;  %v1922_v55 = vpack.c.bf16 %v1350_v46, %v1349_v40 }
 0xf86   :  { %1996 = vtanh.f32 %v1310_v63 }
 0xf88   :  { %1921 = vmatpush3.bf16.msra.mxu1 %v1918_v35 }
 0xf89   :  { %1923 = vmatprep.subr.bf16.mxu1 %v1922_v55 }
 0xf8c   :  { %1925 = vmatpush3.bf16.msra.mxu1 %v1922_v55 }
 0xf8d   :  { %1927 = vmatprep.subr.bf16.mxu1 %v1926_v62 }
 0xf8f   :  { %v1995_v10 = vpop.eup %1994 }
 0xf90   :  { %v1997_v31 = vpop.eup %1996  ;;  %v1313_v33 = vadd.f32 1.0, %v1995_v10  ;;  %1929 = vmatpush3.bf16.msra.mxu1 %v1926_v62 }
 0xf91   :  { %v1314_v54 = vadd.f32 1.0, %v1997_v31 }
 0xf92   :  { %v1315_v16 = vmul.f32 0.5, %v1313_v33 }
 0xf93   :  { %v1316_v8 = vmul.f32 0.5, %v1314_v54 }
 0xf94   :  { %v1323_v21 = vmul.f32 %v1321_v9, %v1315_v16 }
 0xf95   :  { %v1318_v23 = vsel %vm383_vm12, %v1997_v31, %v1316_v8 }
 0xf96   :  { %v1324_v24 = vmul.f32 %v1318_v23, %v1315_v16 }
 0xf98   :  { %1326 = vrot.lane.b32.xlu1 %v1324_v24, %s2085_s5 }
0x100a   :  { %v1327_v49 = vpop.permute.xlu1 %1326 }
0x100b   :  { %v1329_v38 = vadd.f32 %v1327_v49, %v1323_v21 }
0x100d   :  { %1998 = vtanh.f32 %v1329_v38 }
0x1017   :  { %v1999_v34 = vpop.eup %1998 }
0x1018   :  { %v1331_v43 = vmul.f32 %v1999_v34, %v1318_v23 }
0x101a   :  { %1333 = vrot.lane.b32.xlu0 %v1331_v43, %s2085_s5 }
0x108c   :  { %v1334_v44 = vpop.permute.xlu0 %1333 }
0x108d   :  { %v1336_v53 = vsel %vm434_vm0, %v1334_v44, 0.0 }
0x108e   :  { %v1337_v59 = vsel %vm241_vm9, %v2505_v48, %v1336_v53  ;;  %v1344_v36 = vsel %vm241_vm9, %v1336_v53, %v2505_v48 }
0x108f   :  { %1734 = vmatprep.mubr.msk.f32.mxu1 %vm453_vm14, %v1337_v59 }
0x1090   :  { %1735 = vmatmul.mubr.msk.f32.vlgmr.msra.gmra.mrb[16].mxu1 %vm453_vm14, %v1338_v45 }
0x1091   :  { %1737 = vmatprep.mubr.msk.f32.mxu1 %vm453_vm14, %v2699_v6 }
0x1094   :  { %1738 = vmatmul.mubr.msk.f32.gmra.mrb[18].mxu1 %vm453_vm14, %v2660_v1 }
0x1095   :  { %1740 = vmatprep.mubr.msk.f32.mxu1 %vm453_vm14, %v2663_v26 }
0x1098   :  { %1741 = vmatmul.mubr.msk.f32.gmra.mrb[20].mxu1 %vm453_vm14, %v2702_v19 }
0x1099   :  { %1743 = vmatprep.mubr.msk.f32.mxu1 %vm453_vm14, %v1343_v25 }
0x109c   :  { %1744 = vmatmul.mubr.msk.f32.gmra.mrb[22].mxu1 %vm453_vm14, %v1344_v36 }
0x1163   :  { %v1736_v6 = vpop.f32.mrb[16].mxu1 }
0x1164   :  { %v1456_v7 = vadd.f32 %v1736_v6, %v1625_v37  ;;  %v1450_v1 = vpop.f32.mrb[17].mxu1 }
0x1165   :  { %v1451_v20 = vadd.f32 %v1625_v37, %v1450_v1 }
0x1166   :  { %1491 = vmax.xlane.f32.xlu0 %v1456_v7 }
0x1167   :  { %v1739_v26 = vpop.f32.mrb[18].mxu1  ;;  %1489 = vmax.xlane.f32.xlu1 %v1451_v20 }
0x1168   :  { %v1466_v47 = vadd.f32 %v1739_v26, %v1625_v37  ;;  %v1460_v19 = vpop.f32.mrb[19].mxu1 }
0x1169   :  { %v1461_v4 = vadd.f32 %v1625_v37, %v1460_v19 }
0x116b   :  { %v1742_v39 = vpop.f32.mrb[20].mxu1  ;;  %1493 = vmax.xlane.f32.xlu0 %v1461_v4  ;;  %1495 = vmax.xlane.f32.xlu1 %v1466_v47 }
0x116c   :  { %v1476_v48 = vadd.f32 %v1742_v39, %v1625_v37  ;;  %v1470_v11 = vpop.f32.mrb[21].mxu1 }
0x116d   :  { %v1471_v17 = vadd.f32 %v1625_v37, %v1470_v11 }
0x116f   :  { %v1745_v42 = vpop.f32.mrb[22].mxu1  ;;  %1497 = vmax.xlane.f32.xlu0 %v1471_v17  ;;  %1499 = vmax.xlane.f32.xlu1 %v1476_v48 }
0x1170   :  { %v1486_v15 = vadd.f32 %v1745_v42, %v1625_v37  ;;  %v1480_v22 = vpop.f32.mrb[23].mxu1 }
0x1171   :  { %v1481_v58 = vadd.f32 %v1625_v37, %v1480_v22 }
0x1173   :  { %1501 = vmax.xlane.f32.xlu0 %v1481_v58  ;;  %1503 = vmax.xlane.f32.xlu1 %v1486_v15 }
0x11f3   :  { %v1492_v5 = vpop.xlane.xlu0 %1491 }
0x11f4   :  { %v2791_v12 = vsub.f32 %v1456_v7, %v1492_v5  ;;  %v1490_v13 = vpop.xlane.xlu1 %1489 }
0x11f5   :  { %v2793_v18 = vsub.f32 %v1451_v20, %v1490_v13 }
0x11f6   :  { %v1515_v27 = vmul.f32 1.442695, %v2791_v12 }
0x11f7   :  { %v1513_v28 = vmul.f32 1.442695, %v2793_v18 }
0x11f8   :  { %2000 = vpow2.f32 %v1515_v27  ;;  %v1494_v0 = vpop.xlane.xlu0 %1493  ;;  %v1496_v61 = vpop.xlane.xlu1 %1495 }
0x11f9   :  { %2002 = vpow2.f32 %v1513_v28  ;;  %v2797_v52 = vsub.f32 %v1461_v4, %v1494_v0  ;;  %v2799_v45 = vsub.f32 %v1466_v47, %v1496_v61 }
0x11fb   :  { %v1517_v25 = vmul.f32 1.442695, %v2797_v52  ;;  %v1519_v56 = vmul.f32 1.442695, %v2799_v45 }
0x11fc   :  { %v1498_v3 = vpop.xlane.xlu0 %1497  ;;  %v1500_v50 = vpop.xlane.xlu1 %1499 }
0x11fd   :  { %2004 = vpow2.f32 %v1517_v25  ;;  %v2803_v57 = vsub.f32 %v1471_v17, %v1498_v3  ;;  %v2805_v14 = vsub.f32 %v1476_v48, %v1500_v50 }
0x11fe   :  { %2006 = vpow2.f32 %v1519_v56 }
0x11ff   :  { %v1521_v63 = vmul.f32 1.442695, %v2803_v57  ;;  %v1523_v10 = vmul.f32 1.442695, %v2805_v14 }
0x1200   :  { %v1502_v31 = vpop.xlane.xlu0 %1501  ;;  %v1504_v33 = vpop.xlane.xlu1 %1503 }
0x1201   :  { %2008 = vpow2.f32 %v1521_v63  ;;  %v2809_v54 = vsub.f32 %v1481_v58, %v1502_v31  ;;  %v2811_v8 = vsub.f32 %v1486_v15, %v1504_v33 }
0x1202   :  { %v2001_v16 = vpop.eup %2000  ;;  %2010 = vpow2.f32 %v1523_v10 }
0x1203   :  { %v2003_v23 = vpop.eup %2002  ;;  %v1525_v24 = vmul.f32 1.442695, %v2809_v54  ;;  %v1527_v60 = vmul.f32 1.442695, %v2811_v8  ;;  %1531 = vadd.xlane.f32.xlu1 %v2001_v16 }
0x1204   :  { %1529 = vadd.xlane.f32.xlu0 %v2003_v23 }
0x1205   :  { %2012 = vpow2.f32 %v1525_v24 }
0x1206   :  { %2014 = vpow2.f32 %v1527_v60 }
0x1207   :  { %v2005_v29 = vpop.eup %2004 }
0x1208   :  { %v2007_v30 = vpop.eup %2006  ;;  %1533 = vadd.xlane.f32.xlu0 %v2005_v29 }
0x1209   :  { %1535 = vadd.xlane.f32.xlu1 %v2007_v30 }
0x120b   :  { %v2009_v32 = vpop.eup %2008 }
0x120c   :  { %v2011_v41 = vpop.eup %2010  ;;  %1537 = vadd.xlane.f32.xlu0 %v2009_v32 }
0x120d   :  { %1539 = vadd.xlane.f32.xlu1 %v2011_v41 }
0x120f   :  { %v2013_v35 = vpop.eup %2012 }
0x1210   :  { %v2015_v40 = vpop.eup %2014  ;;  %1541 = vadd.xlane.f32.xlu0 %v2013_v35 }
0x1211   :  { %1543 = vadd.xlane.f32.xlu1 %v2015_v40 }
0x1290   :  { %v1532_v46 = vpop.xlane.xlu1 %1531 }
0x1291   :  { %2016 = vlog2.f32 %v1532_v46  ;;  %v1530_v55 = vpop.xlane.xlu0 %1529 }
0x1292   :  { %2018 = vlog2.f32 %v1530_v55 }
0x1295   :  { %v1534_v2 = vpop.xlane.xlu0 %1533 }
0x1296   :  { %2020 = vlog2.f32 %v1534_v2  ;;  %v1536_v51 = vpop.xlane.xlu1 %1535 }
0x1297   :  { %2022 = vlog2.f32 %v1536_v51 }
0x1299   :  { %v1538_v62 = vpop.xlane.xlu0 %1537 }
0x129a   :  { %2024 = vlog2.f32 %v1538_v62  ;;  %v1540_v9 = vpop.xlane.xlu1 %1539 }
0x129b   :  { %v2017_v21 = vpop.eup %2016  ;;  %2026 = vlog2.f32 %v1540_v9 }
0x129c   :  { %v2019_v49 = vpop.eup %2018  ;;  %v1548_v38 = vmul.f32 0.6931472, %v2017_v21 }
0x129d   :  { %v1546_v34 = vmul.f32 0.6931472, %v2019_v49  ;;  %v1542_v43 = vpop.xlane.xlu0 %1541 }
0x129e   :  { %v1562_v44 = vsub.f32 %v2791_v12, %v1548_v38  ;;  %2028 = vlog2.f32 %v1542_v43  ;;  %v1544_v53 = vpop.xlane.xlu1 %1543 }
0x129f   :  { %v1561_v59 = vsub.f32 %v2793_v18, %v1546_v34  ;;  %2030 = vlog2.f32 %v1544_v53 }
0x12a0   :  { %v2021_v36 = vpop.eup %2020  ;;  %1570 = vst [vmem:[#allocation5 + $0x8] sm:$0xff] %v1562_v44 }
0x12a1   :  { %v2023_v37 = vpop.eup %2022  ;;  %1569 = vst [vmem:[#allocation5] sm:$0xff] %v1561_v59  ;;  %v1550_v6 = vmul.f32 0.6931472, %v2021_v36 }
0x12a2   :  { %v1552_v7 = vmul.f32 0.6931472, %v2023_v37 }
0x12a3   :  { %v1563_v1 = vsub.f32 %v2797_v52, %v1550_v6 }
0x12a4   :  { %v2025_v20 = vpop.eup %2024  ;;  %v1564_v26 = vsub.f32 %v2799_v45, %v1552_v7 }
0x12a5   :  { %v2027_v47 = vpop.eup %2026  ;;  %1571 = vst [vmem:[#allocation5 + $0x10] sm:$0xff] %v1563_v1  ;;  %v1554_v19 = vmul.f32 0.6931472, %v2025_v20 }
0x12a6   :  { %1572 = vst [vmem:[#allocation5 + $0x18] sm:$0xff] %v1564_v26  ;;  %v1556_v4 = vmul.f32 0.6931472, %v2027_v47 }
0x12a7   :  { %v1565_v39 = vsub.f32 %v2803_v57, %v1554_v19 }
0x12a8   :  { %v2029_v48 = vpop.eup %2028  ;;  %v1566_v11 = vsub.f32 %v2805_v14, %v1556_v4 }
0x12a9   :  { %v2031_v17 = vpop.eup %2030  ;;  %1573 = vst [vmem:[#allocation5 + $0x20] sm:$0xff] %v1565_v39  ;;  %v1558_v42 = vmul.f32 0.6931472, %v2029_v48 }
0x12aa   :  { %1574 = vst [vmem:[#allocation5 + $0x28] sm:$0xff] %v1566_v11  ;;  %v1560_v15 = vmul.f32 0.6931472, %v2031_v17 }
0x12ab   :  { %v1567_v22 = vsub.f32 %v2809_v54, %v1558_v42 }
0x12ac   :  { %v1568_v58 = vsub.f32 %v2811_v8, %v1560_v15 }
0x12ad   :  { %1575 = vst [vmem:[#allocation5 + $0x30] sm:$0xff] %v1567_v22 }
0x12ae   :  { %1576 = vst [vmem:[#allocation5 + $0x38] sm:$0xff] %v1568_v58 }
0x12af   :  { %2065 = shalt.err (!%p2062_p12)
}
0x12b0   :  { %s2066_s10 = scalar_lea.hbm %s2843_s8, 1024 }
0x12b1   :  { %p2067_p13 = scmp.ne.s32.totalorder %s2843_s8, %s2066_s10  ;;  %p2070_p0 = scmp.lt.u32.totalorder %s2066_s10, %s2843_s8 }
0x12b3   :  { %p2072_p1 = pnand %p2070_p0, %p2067_p13 }
0x12b5   :  { %2075 = shalt.err (!%p2072_p1)
}
0x12b6   :  { %s2094_s13 = smov 128   ;;  %s2095_s5 = smov 8  }
0x12b7   :  { %1588 = dma.vmem_to_hbm [thread:$0]  %s1583_s29, 1024, %s2843_s8, [#allocation4], %s2094_s13, %s2094_s13, %s2095_s5  }
0x12b8   :  { %2078 = dma.done.wait [#allocation4], 1024  }
0x12b9   :  { %2079 = vsyncadd [#allocation4], 4294966272 }
0x12ba   :  { %1592 = vsyncpa [#allocation3], 1 }
0x12bb   :  { %1593 = vsyncpa [#allocation4], 1 }

</bundles_post_ra>
